<compile_context>
chip_gen: v7x
topology: tpu7x:2x2x1
jax: 0.10.0
libtpu: 0.0.40
codegen_flags: <defaults>
</compile_context>

<pallas_src>
import numpy as np
import jax
import jax.numpy as jnp
from jax.experimental import pallas as pl
from jax.experimental.pallas import tpu as pltpu


def _round_up(x, m):
    return (x + m - 1) // m * m


# ------------------------------ LSTM kernel ---------------------------------
def make_lstm_kernel(T, Bp, Hp):
    """Whole LSTM (hoisted input projection + T recurrent steps) in one grid point."""

    def kernel(x_ref, lens_ref, wih_ref, whh_ref, b_ref,
               y_ref, ht_ref, ct_ref, gx_sc):
        # Hoisted input projection: one big MXU matmul over all T*Bp rows.
        x_bf = x_ref[...].astype(jnp.bfloat16)
        gx_sc[...] = (jnp.dot(x_bf, wih_ref[...],
                              preferred_element_type=jnp.float32)
                      + b_ref[...])                       # [T*Bp, 4*Hp], gate order i,f,g,o

        lens = lens_ref[...]                              # [Bp, 1] int32, loaded once

        def sig(z):                                       # 1 EUP op (tanh) per gate
            return 0.5 * jnp.tanh(0.5 * z) + 0.5

        def step(t, carry):
            h, c = carry                                  # [Bp, Hp] f32 state
            row = pl.multiple_of(t * Bp, Bp)
            gx = gx_sc[pl.ds(row, Bp), :]                 # [Bp, 4*Hp]
            # recurrent matmul (kept f32; see header note for bf16 switch)
            gates = gx + jnp.dot(h, whh_ref[...],
                                 preferred_element_type=jnp.float32)
            # lane-aligned gate slabs (Hp multiple of 128) -> free views
            i = sig(gates[:, 0 * Hp:1 * Hp])
            f = sig(gates[:, 1 * Hp:2 * Hp])
            g = jnp.tanh(gates[:, 2 * Hp:3 * Hp])
            o = sig(gates[:, 3 * Hp:4 * Hp])
            c_new = f * c + i * g
            h_new = o * jnp.tanh(c_new)
            # packed-sequence semantics: freeze state once a sequence ended
            active = lens > t                             # [Bp, 1] bool
            c_u = jnp.where(active, c_new, c)
            h_u = jnp.where(active, h_new, h)
            y_ref[pl.ds(row, Bp), :] = h_u                # per-step hidden output
            return h_u, c_u

        h0 = jnp.zeros((Bp, Hp), jnp.float32)
        c0 = jnp.zeros((Bp, Hp), jnp.float32)
        hT, cT = jax.lax.fori_loop(0, T, step, (h0, c0), unroll=True)
        # final state written once
        ht_ref[...] = hT
        ct_ref[...] = cT

    return kernel


def lstm_forward(x2d, lens, w_ih_t, w_hh_t, bias, *, T, Bp, Hp):
    D = x2d.shape[1]
    grid_spec = pltpu.PrefetchScalarGridSpec(
        num_scalar_prefetch=0,
        grid=(1,),                                   # time loop lives inside the kernel
        in_specs=[
            pl.BlockSpec((T * Bp, D), lambda i: (0, 0)),       # x, time-major rows
            pl.BlockSpec((Bp, 1), lambda i: (0, 0)),           # int32 lengths
            pl.BlockSpec((D, 4 * Hp), lambda i: (0, 0)),       # W_ih^T (bf16, slab-padded)
            pl.BlockSpec((Hp, 4 * Hp), lambda i: (0, 0)),      # W_hh^T (f32, slab-padded)
            pl.BlockSpec((1, 4 * Hp), lambda i: (0, 0)),       # b_ih + b_hh
        ],
        out_specs=[
            pl.BlockSpec((T * Bp, Hp), lambda i: (0, 0)),      # per-step h
            pl.BlockSpec((Bp, Hp), lambda i: (0, 0)),          # final h
            pl.BlockSpec((Bp, Hp), lambda i: (0, 0)),          # final c
        ],
        scratch_shapes=[pltpu.VMEM((T * Bp, 4 * Hp), jnp.float32)],
    )
    return pl.pallas_call(
        make_lstm_kernel(T, Bp, Hp),
        grid_spec=grid_spec,
        out_shape=(
            jax.ShapeDtypeStruct((T * Bp, Hp), jnp.float32),
            jax.ShapeDtypeStruct((Bp, Hp), jnp.float32),
            jax.ShapeDtypeStruct((Bp, Hp), jnp.float32),
        ),
        compiler_params=pltpu.CompilerParams(
            dimension_semantics=("arbitrary",)),      # sequential recurrence
    )(x2d, lens, w_ih_t, w_hh_t, bias)


# ------------------------------ Linear kernel -------------------------------
def linear_kernel(x_ref, w_ref, b_ref, o_ref):
    o_ref[...] = (jnp.dot(x_ref[...].astype(jnp.bfloat16), w_ref[...],
                          preferred_element_type=jnp.float32) + b_ref[...])


def linear_forward(x, w_t, b):
    N, Hp = x.shape
    Vp = w_t.shape[1]
    rt = 512 if N % 512 == 0 else N                   # row tile (lane-dense Vp output)
    return pl.pallas_call(
        linear_kernel,
        grid=(N // rt,),
        in_specs=[pl.BlockSpec((rt, Hp), lambda i: (i, 0)),
                  pl.BlockSpec((Hp, Vp), lambda i: (0, 0)),
                  pl.BlockSpec((1, Vp), lambda i: (0, 0))],
        out_specs=pl.BlockSpec((rt, Vp), lambda i: (i, 0)),
        out_shape=jax.ShapeDtypeStruct((N, Vp), jnp.float32),
        compiler_params=pltpu.CompilerParams(
            dimension_semantics=("parallel",)),       # megacore-splittable (v7x)
    )(x, w_t, b)


# ------------------------------ Model wrapper --------------------------------
class PallasModel:
    def __init__(self, vocab_size, embedding_dim, input_size, hidden_size, key):
        assert embedding_dim == input_size
        V, D, H = vocab_size, input_size, hidden_size
        self.vocab, self.D, self.H = V, D, H
        self.Hp = max(_round_up(H, 128), 128)         # lane-aligned gate slabs
        self.Vp = max(_round_up(V, 128), 128)         # lane-dense linear output
        self.Bp = 8                                   # sublane-padded batch
        Hp, Vp = self.Hp, self.Vp

        ks = jax.random.split(key, 6)
        s = 1.0 / np.sqrt(H)
        self.emb_table = jax.random.normal(ks[0], (V, D), jnp.float32)
        w_ih = np.asarray(jax.random.uniform(ks[1], (4 * H, D), jnp.float32, -s, s))
        w_hh = np.asarray(jax.random.uniform(ks[2], (4 * H, H), jnp.float32, -s, s))
        b_ih = np.asarray(jax.random.uniform(ks[3], (4 * H,), jnp.float32, -s, s))
        b_hh = np.asarray(jax.random.uniform(ks[4], (4 * H,), jnp.float32, -s, s))
        w_lin = np.asarray(jax.random.uniform(ks[5], (V, H), jnp.float32, -s, s))

        def gate_slab_pad(w_t):   # [X, 4H] -> [X, 4*Hp], gate k at cols [k*Hp, k*Hp+H)
            X = w_t.shape[0]
            out = np.zeros((X, 4, Hp), np.float32)
            out[:, :, :H] = w_t.reshape(X, 4, H)
            return out.reshape(X, 4 * Hp)

        # unpadded f32 copies for the numpy reference
        self.w_ih_t_f32 = np.ascontiguousarray(w_ih.T)            # [D, 4H]
        self.w_hh_t_f32 = np.ascontiguousarray(w_hh.T)            # [H, 4H]
        self.b_f32 = (b_ih + b_hh)[None, :].astype(np.float32)    # [1, 4H]
        self.w_lin_t_f32 = np.ascontiguousarray(w_lin.T)          # [H, V]
        # TODO(synk): PyTorch Linear's default bias init is uniform(-1/sqrt(H),1/sqrt(H));
        # zeros kept here (init difference only, not a kernel issue).
        self.b_lin_f32 = np.zeros((1, V), np.float32)

        # padded / lane-aligned kernel parameters
        wih_p = gate_slab_pad(self.w_ih_t_f32)                    # [D, 4*Hp]
        whh_p = np.zeros((Hp, 4 * Hp), np.float32)
        whh_p[:H] = gate_slab_pad(self.w_hh_t_f32)                # [Hp, 4*Hp]
        b_p = gate_slab_pad(self.b_f32)                           # [1, 4*Hp]
        wlin_p = np.zeros((Hp, Vp), np.float32)
        wlin_p[:H, :V] = self.w_lin_t_f32
        blin_p = np.zeros((1, Vp), np.float32)
        blin_p[:, :V] = self.b_lin_f32

        self.w_ih_t = jnp.asarray(wih_p, jnp.bfloat16)            # bf16 MXU operand
        self.w_hh_t = jnp.asarray(whh_p, jnp.float32)             # f32 recurrent matmul
        self.b_lstm = jnp.asarray(b_p, jnp.float32)
        self.w_lin_t = jnp.asarray(wlin_p, jnp.bfloat16)          # bf16 MXU operand
        self.b_lin = jnp.asarray(blin_p, jnp.float32)

    def embed(self, seq_tensor_sorted):
        # Embedding lookup left as XLA gather glue.
        emb = jnp.take(self.emb_table, seq_tensor_sorted, axis=0)     # [B, T, D]
        return jnp.transpose(emb, (1, 0, 2)).astype(jnp.float32)      # [T, B, D]

    def forward(self, x_tbd, lengths_sorted):
        T, B, D = x_tbd.shape
        Bp, Hp, H, V = self.Bp, self.Hp, self.H, self.vocab
        lens = np.asarray(lengths_sorted)

        # sublane-pad batch and flatten to time-major rows (free XLA reshape)
        x_pad = jnp.zeros((T, Bp, D), jnp.float32).at[:, :B, :].set(x_tbd)
        x2d = x_pad.reshape(T * Bp, D)
        lens_pad = jnp.zeros((Bp, 1), jnp.int32).at[:B, 0].set(
            jnp.asarray(lens, jnp.int32))

        y2d, ht_p, ct_p = lstm_forward(x2d, lens_pad, self.w_ih_t, self.w_hh_t,
                                       self.b_lstm, T=T, Bp=Bp, Hp=Hp)

        # Linear over the full padded [T*Bp, Hp] slab (lane-dense Vp output);
        # packed-row gather happens AFTER the matmul.
        logits_full = linear_forward(y2d, self.w_lin_t, self.b_lin)   # [T*Bp, Vp]

        # pack_padded_sequence ordering: time-major over still-active batches
        idx = np.asarray([t * Bp + b for t in range(T) for b in range(B)
                          if lens[b] > t], np.int32)
        logits = logits_full[jnp.asarray(idx)][:, :V]

        ht = ht_p[:B, :H][None]                       # [1, B, H] like PyTorch
        ct = ct_p[:B, :H][None]
        return logits, (ht, ct)


# ------------------------------ numpy reference ------------------------------
def _rb(a):
    """Emulate the kernels' bf16 operand cast (round f32 -> bf16 -> f32)."""
    return np.asarray(jnp.asarray(np.asarray(a, np.float32))
                      .astype(jnp.bfloat16).astype(jnp.float32))


def reference_forward(model, x_tbd, lengths):
    H = model.H
    T, B, _ = x_tbd.shape
    lens = np.asarray(lengths)

    x = _rb(x_tbd)                                   # bf16-rounded, as the kernel casts x
    wih = _rb(model.w_ih_t_f32)                      # bf16-rounded weights
    whh = np.asarray(model.w_hh_t_f32)               # f32 (matches kernel)
    wlin = _rb(model.w_lin_t_f32)
    b = np.asarray(model.b_f32)

    def sig(z):
        return 0.5 * np.tanh(0.5 * z) + 0.5

    gx = (np.einsum('tbd,dg->tbg', x, wih) + b).astype(np.float32)

    h = np.zeros((B, H), np.float32)
    c = np.zeros((B, H), np.float32)
    ys = []
    for t in range(T):
        gates = gx[t] + h @ whh
        i = sig(gates[:, 0 * H:1 * H])
        f = sig(gates[:, 1 * H:2 * H])
        g = np.tanh(gates[:, 2 * H:3 * H])
        o = sig(gates[:, 3 * H:4 * H])
        c_new = f * c + i * g
        h_new = o * np.tanh(c_new)
        active = (lens > t)[:, None]
        c = np.where(active, c_new, c).astype(np.float32)
        h = np.where(active, h_new, h).astype(np.float32)
        ys.append(h.copy())
    y = np.stack(ys, 0)                              # [T, B, H]
    rows = np.stack([y[t, bb] for t in range(T) for bb in range(B)
                     if lens[bb] > t], 0)
    logits = _rb(rows) @ wlin + np.asarray(model.b_lin_f32)
    return logits.astype(np.float32), h, c


# ------------------------------ demo ------------------------------------------
if __name__ == "__main__":
    VOCAB, D, H = 12, 16, 32
    B, T = 4, 8
    lengths_sorted = np.array([8, 6, 3, 2], dtype=np.int64)    # sorted descending

    key = jax.random.PRNGKey(0)
    k_model, k_seq = jax.random.split(key)
    model = PallasModel(VOCAB, embedding_dim=D, input_size=D,
                        hidden_size=H, key=k_model)

    # seq_tensor_sorted: [B, T] token ids, zero-padded past each length
    seq = jax.random.randint(k_seq, (B, T), 1, VOCAB, jnp.int32)
    pad_mask = jnp.asarray(np.arange(T)[None, :] < lengths_sorted[:, None])
    seq_tensor_sorted = jnp.where(pad_mask, seq, 0)

    x_tbd = model.embed(seq_tensor_sorted)                      # [T, B, D]
    logits, (ht, ct) = model.forward(x_tbd, lengths_sorted)
    logits = jax.block_until_ready(logits)
    ht = jax.block_until_ready(ht)
    ct = jax.block_until_ready(ct)

    # correctness vs a pure-numpy reference that mirrors the kernels' bf16
    # operand rounding (matmul products/accumulation are f32 in both).
    ref_logits, ref_h, ref_c = reference_forward(model, np.asarray(x_tbd),
                                                 lengths_sorted)
    np.testing.assert_allclose(np.asarray(logits), ref_logits,
                               atol=1e-3, rtol=1e-3)            # bf16-ulp level
    np.testing.assert_allclose(np.asarray(ht[0]), ref_h, atol=2e-4, rtol=2e-4)
    np.testing.assert_allclose(np.asarray(ct[0]), ref_c, atol=2e-4, rtol=2e-4)

    assert logits.shape == (int(lengths_sorted.sum()), VOCAB)
    assert ht.shape == (1, B, H) and ct.shape == (1, B, H)
    print("KERNEL_OK")
</pallas_src>

<mosaic_0001>
module attributes {stable_mosaic.version = 11 : i64} {
  func.func @kernel(%arg0: i32, %arg1: memref<64x16xf32, #tpu.memory_space<vmem>>, %arg2: memref<8x1xi32, #tpu.memory_space<vmem>>, %arg3: memref<16x512xbf16, #tpu.memory_space<vmem>>, %arg4: memref<128x512xf32, #tpu.memory_space<vmem>>, %arg5: memref<1x512xf32, #tpu.memory_space<vmem>>, %arg6: memref<64x128xf32, #tpu.memory_space<vmem>>, %arg7: memref<8x128xf32, #tpu.memory_space<vmem>>, %arg8: memref<8x128xf32, #tpu.memory_space<vmem>>, %arg9: memref<64x512xf32, #tpu.memory_space<vmem>>) attributes {dimension_semantics = [#tpu.dimension_semantics<arbitrary>], iteration_bounds = array<i64: 1>, scalar_prefetch = 0 : i64, scratch_operands = 1 : i64, tpu.core_type = #tpu.core_type<tc>, window_params = [{pipeline_mode = #tpu.pipeline_mode<synchronous>, transform_indices = @transform_0, window_bounds = array<i64: 64, 16>}, {pipeline_mode = #tpu.pipeline_mode<synchronous>, transform_indices = @transform_1, window_bounds = array<i64: 8, 1>}, {pipeline_mode = #tpu.pipeline_mode<synchronous>, transform_indices = @transform_2, window_bounds = array<i64: 16, 512>}, {pipeline_mode = #tpu.pipeline_mode<synchronous>, transform_indices = @transform_3, window_bounds = array<i64: 128, 512>}, {pipeline_mode = #tpu.pipeline_mode<synchronous>, transform_indices = @transform_4, window_bounds = array<i64: 1, 512>}, {pipeline_mode = #tpu.pipeline_mode<synchronous>, transform_indices = @transform_5, window_bounds = array<i64: 64, 128>}, {pipeline_mode = #tpu.pipeline_mode<synchronous>, transform_indices = @transform_6, window_bounds = array<i64: 8, 128>}, {pipeline_mode = #tpu.pipeline_mode<synchronous>, transform_indices = @transform_7, window_bounds = array<i64: 8, 128>}]} {
    %c0 = arith.constant 0 : index
    %c0_0 = arith.constant 0 : index
    %0 = vector.load %arg1[%c0, %c0_0] : memref<64x16xf32, #tpu.memory_space<vmem>>, vector<64x16xf32>
    %1 = arith.truncf %0 : vector<64x16xf32> to vector<64x16xbf16>
    %c0_1 = arith.constant 0 : index
    %c0_2 = arith.constant 0 : index
    %2 = vector.load %arg3[%c0_1, %c0_2] : memref<16x512xbf16, #tpu.memory_space<vmem>>, vector<16x512xbf16>
    %cst = arith.constant dense<0.000000e+00> : vector<64x512xf32>
    %3 = tpu.matmul %1, %2, %cst {dimension_numbers = #tpu.dot_dimension_numbers<[1], [0], [0], [1], [0, 0, 1, 1], [], []>} : vector<64x16xbf16>, vector<16x512xbf16>, vector<64x512xf32> -> vector<64x512xf32>
    %c0_3 = arith.constant 0 : index
    %c0_4 = arith.constant 0 : index
    %4 = vector.load %arg5[%c0_3, %c0_4] : memref<1x512xf32, #tpu.memory_space<vmem>>, vector<1x512xf32>
    %5 = vector.broadcast %4 : vector<1x512xf32> to vector<64x512xf32>
    %6 = arith.addf %3, %5 : vector<64x512xf32>
    %c0_5 = arith.constant 0 : index
    %c0_6 = arith.constant 0 : index
    %7 = vector.load %arg9[%c0_5, %c0_6] : memref<64x512xf32, #tpu.memory_space<vmem>>, vector<64x512xf32>
    tpu.vector_store %arg9[%c0_5, %c0_6], %6 {strides = array<i32>} : memref<64x512xf32, #tpu.memory_space<vmem>>, vector<64x512xf32>,
    %c0_7 = arith.constant 0 : index
    %c0_8 = arith.constant 0 : index
    %8 = vector.load %arg2[%c0_7, %c0_8] : memref<8x1xi32, #tpu.memory_space<vmem>>, vector<8x1xi32>
    %cst_9 = arith.constant 0.000000e+00 : f32
    %9 = vector.broadcast %cst_9 : f32 to vector<8x128xf32>
    %cst_10 = arith.constant 0.000000e+00 : f32
    %10 = vector.broadcast %cst_10 : f32 to vector<8x128xf32>
    %c0_i32 = arith.constant 0 : i32
    %c8_i32 = arith.constant 8 : i32
    %11 = arith.muli %c0_i32, %c8_i32 : i32
    %12 = tpu.assume_multiple %11, 8 : i32
    %13 = arith.index_cast %12 : i32 to index
    %c0_11 = arith.constant 0 : index
    %14 = vector.load %arg9[%13, %c0_11] : memref<64x512xf32, #tpu.memory_space<vmem>>, vector<8x512xf32>
    %c0_12 = arith.constant 0 : index
    %c0_13 = arith.constant 0 : index
    %15 = vector.load %arg4[%c0_12, %c0_13] : memref<128x512xf32, #tpu.memory_space<vmem>>, vector<128x512xf32>
    %cst_14 = arith.constant dense<0.000000e+00> : vector<8x512xf32>
    %16 = tpu.matmul %9, %15, %cst_14 {dimension_numbers = #tpu.dot_dimension_numbers<[1], [0], [0], [1], [0, 0, 1, 1], [], []>} : vector<8x128xf32>, vector<128x512xf32>, vector<8x512xf32> -> vector<8x512xf32>
    %17 = arith.addf %14, %16 : vector<8x512xf32>
    %18 = vector.extract_strided_slice %17 {offsets = [0, 0], sizes = [8, 128], strides = [1, 1]} : vector<8x512xf32> to vector<8x128xf32>
    %cst_15 = arith.constant 5.000000e-01 : f32
    %19 = vector.broadcast %cst_15 : f32 to vector<8x128xf32>
    %20 = arith.mulf %19, %18 : vector<8x128xf32>
    %21 = math.tanh %20 : vector<8x128xf32>
    %cst_16 = arith.constant 5.000000e-01 : f32
    %22 = vector.broadcast %cst_16 : f32 to vector<8x128xf32>
    %23 = arith.mulf %22, %21 : vector<8x128xf32>
    %cst_17 = arith.constant 5.000000e-01 : f32
    %24 = vector.broadcast %cst_17 : f32 to vector<8x128xf32>
    %25 = arith.addf %23, %24 : vector<8x128xf32>
    %26 = vector.extract_strided_slice %17 {offsets = [0, 128], sizes = [8, 128], strides = [1, 1]} : vector<8x512xf32> to vector<8x128xf32>
    %cst_18 = arith.constant 5.000000e-01 : f32
    %27 = vector.broadcast %cst_18 : f32 to vector<8x128xf32>
    %28 = arith.mulf %27, %26 : vector<8x128xf32>
    %29 = math.tanh %28 : vector<8x128xf32>
    %cst_19 = arith.constant 5.000000e-01 : f32
    %30 = vector.broadcast %cst_19 : f32 to vector<8x128xf32>
    %31 = arith.mulf %30, %29 : vector<8x128xf32>
    %cst_20 = arith.constant 5.000000e-01 : f32
    %32 = vector.broadcast %cst_20 : f32 to vector<8x128xf32>
    %33 = arith.addf %31, %32 : vector<8x128xf32>
    %34 = vector.extract_strided_slice %17 {offsets = [0, 256], sizes = [8, 128], strides = [1, 1]} : vector<8x512xf32> to vector<8x128xf32>
    %35 = math.tanh %34 : vector<8x128xf32>
    %36 = vector.extract_strided_slice %17 {offsets = [0, 384], sizes = [8, 128], strides = [1, 1]} : vector<8x512xf32> to vector<8x128xf32>
    %cst_21 = arith.constant 5.000000e-01 : f32
    %37 = vector.broadcast %cst_21 : f32 to vector<8x128xf32>
    %38 = arith.mulf %37, %36 : vector<8x128xf32>
    %39 = math.tanh %38 : vector<8x128xf32>
    %cst_22 = arith.constant 5.000000e-01 : f32
    %40 = vector.broadcast %cst_22 : f32 to vector<8x128xf32>
    %41 = arith.mulf %40, %39 : vector<8x128xf32>
    %cst_23 = arith.constant 5.000000e-01 : f32
    %42 = vector.broadcast %cst_23 : f32 to vector<8x128xf32>
    %43 = arith.addf %41, %42 : vector<8x128xf32>
    %44 = arith.mulf %33, %10 : vector<8x128xf32>
    %45 = arith.mulf %25, %35 : vector<8x128xf32>
    %46 = arith.addf %44, %45 : vector<8x128xf32>
    %47 = math.tanh %46 : vector<8x128xf32>
    %48 = arith.mulf %43, %47 : vector<8x128xf32>
    %49 = vector.broadcast %c0_i32 : i32 to vector<8x1xi32>
    %50 = arith.cmpi sgt, %8, %49 : vector<8x1xi32>
    %51 = vector.shape_cast %50 : vector<8x1xi1> to vector<8x1xi1>
    %52 = vector.broadcast %51 : vector<8x1xi1> to vector<8x128xi1>
    %53 = arith.select %52, %46, %10 : vector<8x128xi1>, vector<8x128xf32>
    %54 = vector.shape_cast %50 : vector<8x1xi1> to vector<8x1xi1>
    %55 = vector.broadcast %54 : vector<8x1xi1> to vector<8x128xi1>
    %56 = arith.select %55, %48, %9 : vector<8x128xi1>, vector<8x128xf32>
    %57 = arith.index_cast %12 : i32 to index
    %c0_24 = arith.constant 0 : index
    %58 = vector.load %arg6[%57, %c0_24] : memref<64x128xf32, #tpu.memory_space<vmem>>, vector<8x128xf32>
    tpu.vector_store %arg6[%57, %c0_24], %56 {strides = array<i32>} : memref<64x128xf32, #tpu.memory_space<vmem>>, vector<8x128xf32>,
    %c1_i32 = arith.constant 1 : i32
    %c8_i32_25 = arith.constant 8 : i32
    %59 = arith.muli %c1_i32, %c8_i32_25 : i32
    %60 = tpu.assume_multiple %59, 8 : i32
    %61 = arith.index_cast %60 : i32 to index
    %c0_26 = arith.constant 0 : index
    %62 = vector.load %arg9[%61, %c0_26] : memref<64x512xf32, #tpu.memory_space<vmem>>, vector<8x512xf32>
    %c0_27 = arith.constant 0 : index
    %c0_28 = arith.constant 0 : index
    %63 = vector.load %arg4[%c0_27, %c0_28] : memref<128x512xf32, #tpu.memory_space<vmem>>, vector<128x512xf32>
    %cst_29 = arith.constant dense<0.000000e+00> : vector<8x512xf32>
    %64 = tpu.matmul %56, %63, %cst_29 {dimension_numbers = #tpu.dot_dimension_numbers<[1], [0], [0], [1], [0, 0, 1, 1], [], []>} : vector<8x128xf32>, vector<128x512xf32>, vector<8x512xf32> -> vector<8x512xf32>
    %65 = arith.addf %62, %64 : vector<8x512xf32>
    %66 = vector.extract_strided_slice %65 {offsets = [0, 0], sizes = [8, 128], strides = [1, 1]} : vector<8x512xf32> to vector<8x128xf32>
    %cst_30 = arith.constant 5.000000e-01 : f32
    %67 = vector.broadcast %cst_30 : f32 to vector<8x128xf32>
    %68 = arith.mulf %67, %66 : vector<8x128xf32>
    %69 = math.tanh %68 : vector<8x128xf32>
    %cst_31 = arith.constant 5.000000e-01 : f32
    %70 = vector.broadcast %cst_31 : f32 to vector<8x128xf32>
    %71 = arith.mulf %70, %69 : vector<8x128xf32>
    %cst_32 = arith.constant 5.000000e-01 : f32
    %72 = vector.broadcast %cst_32 : f32 to vector<8x128xf32>
    %73 = arith.addf %71, %72 : vector<8x128xf32>
    %74 = vector.extract_strided_slice %65 {offsets = [0, 128], sizes = [8, 128], strides = [1, 1]} : vector<8x512xf32> to vector<8x128xf32>
    %cst_33 = arith.constant 5.000000e-01 : f32
    %75 = vector.broadcast %cst_33 : f32 to vector<8x128xf32>
    %76 = arith.mulf %75, %74 : vector<8x128xf32>
    %77 = math.tanh %76 : vector<8x128xf32>
    %cst_34 = arith.constant 5.000000e-01 : f32
    %78 = vector.broadcast %cst_34 : f32 to vector<8x128xf32>
    %79 = arith.mulf %78, %77 : vector<8x128xf32>
    %cst_35 = arith.constant 5.000000e-01 : f32
    %80 = vector.broadcast %cst_35 : f32 to vector<8x128xf32>
    %81 = arith.addf %79, %80 : vector<8x128xf32>
    %82 = vector.extract_strided_slice %65 {offsets = [0, 256], sizes = [8, 128], strides = [1, 1]} : vector<8x512xf32> to vector<8x128xf32>
    %83 = math.tanh %82 : vector<8x128xf32>
    %84 = vector.extract_strided_slice %65 {offsets = [0, 384], sizes = [8, 128], strides = [1, 1]} : vector<8x512xf32> to vector<8x128xf32>
    %cst_36 = arith.constant 5.000000e-01 : f32
    %85 = vector.broadcast %cst_36 : f32 to vector<8x128xf32>
    %86 = arith.mulf %85, %84 : vector<8x128xf32>
    %87 = math.tanh %86 : vector<8x128xf32>
    %cst_37 = arith.constant 5.000000e-01 : f32
    %88 = vector.broadcast %cst_37 : f32 to vector<8x128xf32>
    %89 = arith.mulf %88, %87 : vector<8x128xf32>
    %cst_38 = arith.constant 5.000000e-01 : f32
    %90 = vector.broadcast %cst_38 : f32 to vector<8x128xf32>
    %91 = arith.addf %89, %90 : vector<8x128xf32>
    %92 = arith.mulf %81, %53 : vector<8x128xf32>
    %93 = arith.mulf %73, %83 : vector<8x128xf32>
    %94 = arith.addf %92, %93 : vector<8x128xf32>
    %95 = math.tanh %94 : vector<8x128xf32>
    %96 = arith.mulf %91, %95 : vector<8x128xf32>
    %97 = vector.broadcast %c1_i32 : i32 to vector<8x1xi32>
    %98 = arith.cmpi sgt, %8, %97 : vector<8x1xi32>
    %99 = vector.shape_cast %98 : vector<8x1xi1> to vector<8x1xi1>
    %100 = vector.broadcast %99 : vector<8x1xi1> to vector<8x128xi1>
    %101 = arith.select %100, %94, %53 : vector<8x128xi1>, vector<8x128xf32>
    %102 = vector.shape_cast %98 : vector<8x1xi1> to vector<8x1xi1>
    %103 = vector.broadcast %102 : vector<8x1xi1> to vector<8x128xi1>
    %104 = arith.select %103, %96, %56 : vector<8x128xi1>, vector<8x128xf32>
    %105 = arith.index_cast %60 : i32 to index
    %c0_39 = arith.constant 0 : index
    %106 = vector.load %arg6[%105, %c0_39] : memref<64x128xf32, #tpu.memory_space<vmem>>, vector<8x128xf32>
    tpu.vector_store %arg6[%105, %c0_39], %104 {strides = array<i32>} : memref<64x128xf32, #tpu.memory_space<vmem>>, vector<8x128xf32>,
    %c2_i32 = arith.constant 2 : i32
    %c8_i32_40 = arith.constant 8 : i32
    %107 = arith.muli %c2_i32, %c8_i32_40 : i32
    %108 = tpu.assume_multiple %107, 8 : i32
    %109 = arith.index_cast %108 : i32 to index
    %c0_41 = arith.constant 0 : index
    %110 = vector.load %arg9[%109, %c0_41] : memref<64x512xf32, #tpu.memory_space<vmem>>, vector<8x512xf32>
    %c0_42 = arith.constant 0 : index
    %c0_43 = arith.constant 0 : index
    %111 = vector.load %arg4[%c0_42, %c0_43] : memref<128x512xf32, #tpu.memory_space<vmem>>, vector<128x512xf32>
    %cst_44 = arith.constant dense<0.000000e+00> : vector<8x512xf32>
    %112 = tpu.matmul %104, %111, %cst_44 {dimension_numbers = #tpu.dot_dimension_numbers<[1], [0], [0], [1], [0, 0, 1, 1], [], []>} : vector<8x128xf32>, vector<128x512xf32>, vector<8x512xf32> -> vector<8x512xf32>
    %113 = arith.addf %110, %112 : vector<8x512xf32>
    %114 = vector.extract_strided_slice %113 {offsets = [0, 0], sizes = [8, 128], strides = [1, 1]} : vector<8x512xf32> to vector<8x128xf32>
    %cst_45 = arith.constant 5.000000e-01 : f32
    %115 = vector.broadcast %cst_45 : f32 to vector<8x128xf32>
    %116 = arith.mulf %115, %114 : vector<8x128xf32>
    %117 = math.tanh %116 : vector<8x128xf32>
    %cst_46 = arith.constant 5.000000e-01 : f32
    %118 = vector.broadcast %cst_46 : f32 to vector<8x128xf32>
    %119 = arith.mulf %118, %117 : vector<8x128xf32>
    %cst_47 = arith.constant 5.000000e-01 : f32
    %120 = vector.broadcast %cst_47 : f32 to vector<8x128xf32>
    %121 = arith.addf %119, %120 : vector<8x128xf32>
    %122 = vector.extract_strided_slice %113 {offsets = [0, 128], sizes = [8, 128], strides = [1, 1]} : vector<8x512xf32> to vector<8x128xf32>
    %cst_48 = arith.constant 5.000000e-01 : f32
    %123 = vector.broadcast %cst_48 : f32 to vector<8x128xf32>
    %124 = arith.mulf %123, %122 : vector<8x128xf32>
    %125 = math.tanh %124 : vector<8x128xf32>
    %cst_49 = arith.constant 5.000000e-01 : f32
    %126 = vector.broadcast %cst_49 : f32 to vector<8x128xf32>
    %127 = arith.mulf %126, %125 : vector<8x128xf32>
    %cst_50 = arith.constant 5.000000e-01 : f32
    %128 = vector.broadcast %cst_50 : f32 to vector<8x128xf32>
    %129 = arith.addf %127, %128 : vector<8x128xf32>
    %130 = vector.extract_strided_slice %113 {offsets = [0, 256], sizes = [8, 128], strides = [1, 1]} : vector<8x512xf32> to vector<8x128xf32>
    %131 = math.tanh %130 : vector<8x128xf32>
    %132 = vector.extract_strided_slice %113 {offsets = [0, 384], sizes = [8, 128], strides = [1, 1]} : vector<8x512xf32> to vector<8x128xf32>
    %cst_51 = arith.constant 5.000000e-01 : f32
    %133 = vector.broadcast %cst_51 : f32 to vector<8x128xf32>
    %134 = arith.mulf %133, %132 : vector<8x128xf32>
    %135 = math.tanh %134 : vector<8x128xf32>
    %cst_52 = arith.constant 5.000000e-01 : f32
    %136 = vector.broadcast %cst_52 : f32 to vector<8x128xf32>
    %137 = arith.mulf %136, %135 : vector<8x128xf32>
    %cst_53 = arith.constant 5.000000e-01 : f32
    %138 = vector.broadcast %cst_53 : f32 to vector<8x128xf32>
    %139 = arith.addf %137, %138 : vector<8x128xf32>
    %140 = arith.mulf %129, %101 : vector<8x128xf32>
    %141 = arith.mulf %121, %131 : vector<8x128xf32>
    %142 = arith.addf %140, %141 : vector<8x128xf32>
    %143 = math.tanh %142 : vector<8x128xf32>
    %144 = arith.mulf %139, %143 : vector<8x128xf32>
    %145 = vector.broadcast %c2_i32 : i32 to vector<8x1xi32>
    %146 = arith.cmpi sgt, %8, %145 : vector<8x1xi32>
    %147 = vector.shape_cast %146 : vector<8x1xi1> to vector<8x1xi1>
    %148 = vector.broadcast %147 : vector<8x1xi1> to vector<8x128xi1>
    %149 = arith.select %148, %142, %101 : vector<8x128xi1>, vector<8x128xf32>
    %150 = vector.shape_cast %146 : vector<8x1xi1> to vector<8x1xi1>
    %151 = vector.broadcast %150 : vector<8x1xi1> to vector<8x128xi1>
    %152 = arith.select %151, %144, %104 : vector<8x128xi1>, vector<8x128xf32>
    %153 = arith.index_cast %108 : i32 to index
    %c0_54 = arith.constant 0 : index
    %154 = vector.load %arg6[%153, %c0_54] : memref<64x128xf32, #tpu.memory_space<vmem>>, vector<8x128xf32>
    tpu.vector_store %arg6[%153, %c0_54], %152 {strides = array<i32>} : memref<64x128xf32, #tpu.memory_space<vmem>>, vector<8x128xf32>,
    %c3_i32 = arith.constant 3 : i32
    %c8_i32_55 = arith.constant 8 : i32
    %155 = arith.muli %c3_i32, %c8_i32_55 : i32
    %156 = tpu.assume_multiple %155, 8 : i32
    %157 = arith.index_cast %156 : i32 to index
    %c0_56 = arith.constant 0 : index
    %158 = vector.load %arg9[%157, %c0_56] : memref<64x512xf32, #tpu.memory_space<vmem>>, vector<8x512xf32>
    %c0_57 = arith.constant 0 : index
    %c0_58 = arith.constant 0 : index
    %159 = vector.load %arg4[%c0_57, %c0_58] : memref<128x512xf32, #tpu.memory_space<vmem>>, vector<128x512xf32>
    %cst_59 = arith.constant dense<0.000000e+00> : vector<8x512xf32>
    %160 = tpu.matmul %152, %159, %cst_59 {dimension_numbers = #tpu.dot_dimension_numbers<[1], [0], [0], [1], [0, 0, 1, 1], [], []>} : vector<8x128xf32>, vector<128x512xf32>, vector<8x512xf32> -> vector<8x512xf32>
    %161 = arith.addf %158, %160 : vector<8x512xf32>
    %162 = vector.extract_strided_slice %161 {offsets = [0, 0], sizes = [8, 128], strides = [1, 1]} : vector<8x512xf32> to vector<8x128xf32>
    %cst_60 = arith.constant 5.000000e-01 : f32
    %163 = vector.broadcast %cst_60 : f32 to vector<8x128xf32>
    %164 = arith.mulf %163, %162 : vector<8x128xf32>
    %165 = math.tanh %164 : vector<8x128xf32>
    %cst_61 = arith.constant 5.000000e-01 : f32
    %166 = vector.broadcast %cst_61 : f32 to vector<8x128xf32>
    %167 = arith.mulf %166, %165 : vector<8x128xf32>
    %cst_62 = arith.constant 5.000000e-01 : f32
    %168 = vector.broadcast %cst_62 : f32 to vector<8x128xf32>
    %169 = arith.addf %167, %168 : vector<8x128xf32>
    %170 = vector.extract_strided_slice %161 {offsets = [0, 128], sizes = [8, 128], strides = [1, 1]} : vector<8x512xf32> to vector<8x128xf32>
    %cst_63 = arith.constant 5.000000e-01 : f32
    %171 = vector.broadcast %cst_63 : f32 to vector<8x128xf32>
    %172 = arith.mulf %171, %170 : vector<8x128xf32>
    %173 = math.tanh %172 : vector<8x128xf32>
    %cst_64 = arith.constant 5.000000e-01 : f32
    %174 = vector.broadcast %cst_64 : f32 to vector<8x128xf32>
    %175 = arith.mulf %174, %173 : vector<8x128xf32>
    %cst_65 = arith.constant 5.000000e-01 : f32
    %176 = vector.broadcast %cst_65 : f32 to vector<8x128xf32>
    %177 = arith.addf %175, %176 : vector<8x128xf32>
    %178 = vector.extract_strided_slice %161 {offsets = [0, 256], sizes = [8, 128], strides = [1, 1]} : vector<8x512xf32> to vector<8x128xf32>
    %179 = math.tanh %178 : vector<8x128xf32>
    %180 = vector.extract_strided_slice %161 {offsets = [0, 384], sizes = [8, 128], strides = [1, 1]} : vector<8x512xf32> to vector<8x128xf32>
    %cst_66 = arith.constant 5.000000e-01 : f32
    %181 = vector.broadcast %cst_66 : f32 to vector<8x128xf32>
    %182 = arith.mulf %181, %180 : vector<8x128xf32>
    %183 = math.tanh %182 : vector<8x128xf32>
    %cst_67 = arith.constant 5.000000e-01 : f32
    %184 = vector.broadcast %cst_67 : f32 to vector<8x128xf32>
    %185 = arith.mulf %184, %183 : vector<8x128xf32>
    %cst_68 = arith.constant 5.000000e-01 : f32
    %186 = vector.broadcast %cst_68 : f32 to vector<8x128xf32>
    %187 = arith.addf %185, %186 : vector<8x128xf32>
    %188 = arith.mulf %177, %149 : vector<8x128xf32>
    %189 = arith.mulf %169, %179 : vector<8x128xf32>
    %190 = arith.addf %188, %189 : vector<8x128xf32>
    %191 = math.tanh %190 : vector<8x128xf32>
    %192 = arith.mulf %187, %191 : vector<8x128xf32>
    %193 = vector.broadcast %c3_i32 : i32 to vector<8x1xi32>
    %194 = arith.cmpi sgt, %8, %193 : vector<8x1xi32>
    %195 = vector.shape_cast %194 : vector<8x1xi1> to vector<8x1xi1>
    %196 = vector.broadcast %195 : vector<8x1xi1> to vector<8x128xi1>
    %197 = arith.select %196, %190, %149 : vector<8x128xi1>, vector<8x128xf32>
    %198 = vector.shape_cast %194 : vector<8x1xi1> to vector<8x1xi1>
    %199 = vector.broadcast %198 : vector<8x1xi1> to vector<8x128xi1>
    %200 = arith.select %199, %192, %152 : vector<8x128xi1>, vector<8x128xf32>
    %201 = arith.index_cast %156 : i32 to index
    %c0_69 = arith.constant 0 : index
    %202 = vector.load %arg6[%201, %c0_69] : memref<64x128xf32, #tpu.memory_space<vmem>>, vector<8x128xf32>
    tpu.vector_store %arg6[%201, %c0_69], %200 {strides = array<i32>} : memref<64x128xf32, #tpu.memory_space<vmem>>, vector<8x128xf32>,
    %c4_i32 = arith.constant 4 : i32
    %c8_i32_70 = arith.constant 8 : i32
    %203 = arith.muli %c4_i32, %c8_i32_70 : i32
    %204 = tpu.assume_multiple %203, 8 : i32
    %205 = arith.index_cast %204 : i32 to index
    %c0_71 = arith.constant 0 : index
    %206 = vector.load %arg9[%205, %c0_71] : memref<64x512xf32, #tpu.memory_space<vmem>>, vector<8x512xf32>
    %c0_72 = arith.constant 0 : index
    %c0_73 = arith.constant 0 : index
    %207 = vector.load %arg4[%c0_72, %c0_73] : memref<128x512xf32, #tpu.memory_space<vmem>>, vector<128x512xf32>
    %cst_74 = arith.constant dense<0.000000e+00> : vector<8x512xf32>
    %208 = tpu.matmul %200, %207, %cst_74 {dimension_numbers = #tpu.dot_dimension_numbers<[1], [0], [0], [1], [0, 0, 1, 1], [], []>} : vector<8x128xf32>, vector<128x512xf32>, vector<8x512xf32> -> vector<8x512xf32>
    %209 = arith.addf %206, %208 : vector<8x512xf32>
    %210 = vector.extract_strided_slice %209 {offsets = [0, 0], sizes = [8, 128], strides = [1, 1]} : vector<8x512xf32> to vector<8x128xf32>
    %cst_75 = arith.constant 5.000000e-01 : f32
    %211 = vector.broadcast %cst_75 : f32 to vector<8x128xf32>
    %212 = arith.mulf %211, %210 : vector<8x128xf32>
    %213 = math.tanh %212 : vector<8x128xf32>
    %cst_76 = arith.constant 5.000000e-01 : f32
    %214 = vector.broadcast %cst_76 : f32 to vector<8x128xf32>
    %215 = arith.mulf %214, %213 : vector<8x128xf32>
    %cst_77 = arith.constant 5.000000e-01 : f32
    %216 = vector.broadcast %cst_77 : f32 to vector<8x128xf32>
    %217 = arith.addf %215, %216 : vector<8x128xf32>
    %218 = vector.extract_strided_slice %209 {offsets = [0, 128], sizes = [8, 128], strides = [1, 1]} : vector<8x512xf32> to vector<8x128xf32>
    %cst_78 = arith.constant 5.000000e-01 : f32
    %219 = vector.broadcast %cst_78 : f32 to vector<8x128xf32>
    %220 = arith.mulf %219, %218 : vector<8x128xf32>
    %221 = math.tanh %220 : vector<8x128xf32>
    %cst_79 = arith.constant 5.000000e-01 : f32
    %222 = vector.broadcast %cst_79 : f32 to vector<8x128xf32>
    %223 = arith.mulf %222, %221 : vector<8x128xf32>
    %cst_80 = arith.constant 5.000000e-01 : f32
    %224 = vector.broadcast %cst_80 : f32 to vector<8x128xf32>
    %225 = arith.addf %223, %224 : vector<8x128xf32>
    %226 = vector.extract_strided_slice %209 {offsets = [0, 256], sizes = [8, 128], strides = [1, 1]} : vector<8x512xf32> to vector<8x128xf32>
    %227 = math.tanh %226 : vector<8x128xf32>
    %228 = vector.extract_strided_slice %209 {offsets = [0, 384], sizes = [8, 128], strides = [1, 1]} : vector<8x512xf32> to vector<8x128xf32>
    %cst_81 = arith.constant 5.000000e-01 : f32
    %229 = vector.broadcast %cst_81 : f32 to vector<8x128xf32>
    %230 = arith.mulf %229, %228 : vector<8x128xf32>
    %231 = math.tanh %230 : vector<8x128xf32>
    %cst_82 = arith.constant 5.000000e-01 : f32
    %232 = vector.broadcast %cst_82 : f32 to vector<8x128xf32>
    %233 = arith.mulf %232, %231 : vector<8x128xf32>
    %cst_83 = arith.constant 5.000000e-01 : f32
    %234 = vector.broadcast %cst_83 : f32 to vector<8x128xf32>
    %235 = arith.addf %233, %234 : vector<8x128xf32>
    %236 = arith.mulf %225, %197 : vector<8x128xf32>
    %237 = arith.mulf %217, %227 : vector<8x128xf32>
    %238 = arith.addf %236, %237 : vector<8x128xf32>
    %239 = math.tanh %238 : vector<8x128xf32>
    %240 = arith.mulf %235, %239 : vector<8x128xf32>
    %241 = vector.broadcast %c4_i32 : i32 to vector<8x1xi32>
    %242 = arith.cmpi sgt, %8, %241 : vector<8x1xi32>
    %243 = vector.shape_cast %242 : vector<8x1xi1> to vector<8x1xi1>
    %244 = vector.broadcast %243 : vector<8x1xi1> to vector<8x128xi1>
    %245 = arith.select %244, %238, %197 : vector<8x128xi1>, vector<8x128xf32>
    %246 = vector.shape_cast %242 : vector<8x1xi1> to vector<8x1xi1>
    %247 = vector.broadcast %246 : vector<8x1xi1> to vector<8x128xi1>
    %248 = arith.select %247, %240, %200 : vector<8x128xi1>, vector<8x128xf32>
    %249 = arith.index_cast %204 : i32 to index
    %c0_84 = arith.constant 0 : index
    %250 = vector.load %arg6[%249, %c0_84] : memref<64x128xf32, #tpu.memory_space<vmem>>, vector<8x128xf32>
    tpu.vector_store %arg6[%249, %c0_84], %248 {strides = array<i32>} : memref<64x128xf32, #tpu.memory_space<vmem>>, vector<8x128xf32>,
    %c5_i32 = arith.constant 5 : i32
    %c8_i32_85 = arith.constant 8 : i32
    %251 = arith.muli %c5_i32, %c8_i32_85 : i32
    %252 = tpu.assume_multiple %251, 8 : i32
    %253 = arith.index_cast %252 : i32 to index
    %c0_86 = arith.constant 0 : index
    %254 = vector.load %arg9[%253, %c0_86] : memref<64x512xf32, #tpu.memory_space<vmem>>, vector<8x512xf32>
    %c0_87 = arith.constant 0 : index
    %c0_88 = arith.constant 0 : index
    %255 = vector.load %arg4[%c0_87, %c0_88] : memref<128x512xf32, #tpu.memory_space<vmem>>, vector<128x512xf32>
    %cst_89 = arith.constant dense<0.000000e+00> : vector<8x512xf32>
    %256 = tpu.matmul %248, %255, %cst_89 {dimension_numbers = #tpu.dot_dimension_numbers<[1], [0], [0], [1], [0, 0, 1, 1], [], []>} : vector<8x128xf32>, vector<128x512xf32>, vector<8x512xf32> -> vector<8x512xf32>
    %257 = arith.addf %254, %256 : vector<8x512xf32>
    %258 = vector.extract_strided_slice %257 {offsets = [0, 0], sizes = [8, 128], strides = [1, 1]} : vector<8x512xf32> to vector<8x128xf32>
    %cst_90 = arith.constant 5.000000e-01 : f32
    %259 = vector.broadcast %cst_90 : f32 to vector<8x128xf32>
    %260 = arith.mulf %259, %258 : vector<8x128xf32>
    %261 = math.tanh %260 : vector<8x128xf32>
    %cst_91 = arith.constant 5.000000e-01 : f32
    %262 = vector.broadcast %cst_91 : f32 to vector<8x128xf32>
    %263 = arith.mulf %262, %261 : vector<8x128xf32>
    %cst_92 = arith.constant 5.000000e-01 : f32
    %264 = vector.broadcast %cst_92 : f32 to vector<8x128xf32>
    %265 = arith.addf %263, %264 : vector<8x128xf32>
    %266 = vector.extract_strided_slice %257 {offsets = [0, 128], sizes = [8, 128], strides = [1, 1]} : vector<8x512xf32> to vector<8x128xf32>
    %cst_93 = arith.constant 5.000000e-01 : f32
    %267 = vector.broadcast %cst_93 : f32 to vector<8x128xf32>
    %268 = arith.mulf %267, %266 : vector<8x128xf32>
    %269 = math.tanh %268 : vector<8x128xf32>
    %cst_94 = arith.constant 5.000000e-01 : f32
    %270 = vector.broadcast %cst_94 : f32 to vector<8x128xf32>
    %271 = arith.mulf %270, %269 : vector<8x128xf32>
    %cst_95 = arith.constant 5.000000e-01 : f32
    %272 = vector.broadcast %cst_95 : f32 to vector<8x128xf32>
    %273 = arith.addf %271, %272 : vector<8x128xf32>
    %274 = vector.extract_strided_slice %257 {offsets = [0, 256], sizes = [8, 128], strides = [1, 1]} : vector<8x512xf32> to vector<8x128xf32>
    %275 = math.tanh %274 : vector<8x128xf32>
    %276 = vector.extract_strided_slice %257 {offsets = [0, 384], sizes = [8, 128], strides = [1, 1]} : vector<8x512xf32> to vector<8x128xf32>
    %cst_96 = arith.constant 5.000000e-01 : f32
    %277 = vector.broadcast %cst_96 : f32 to vector<8x128xf32>
    %278 = arith.mulf %277, %276 : vector<8x128xf32>
    %279 = math.tanh %278 : vector<8x128xf32>
    %cst_97 = arith.constant 5.000000e-01 : f32
    %280 = vector.broadcast %cst_97 : f32 to vector<8x128xf32>
    %281 = arith.mulf %280, %279 : vector<8x128xf32>
    %cst_98 = arith.constant 5.000000e-01 : f32
    %282 = vector.broadcast %cst_98 : f32 to vector<8x128xf32>
    %283 = arith.addf %281, %282 : vector<8x128xf32>
    %284 = arith.mulf %273, %245 : vector<8x128xf32>
    %285 = arith.mulf %265, %275 : vector<8x128xf32>
    %286 = arith.addf %284, %285 : vector<8x128xf32>
    %287 = math.tanh %286 : vector<8x128xf32>
    %288 = arith.mulf %283, %287 : vector<8x128xf32>
    %289 = vector.broadcast %c5_i32 : i32 to vector<8x1xi32>
    %290 = arith.cmpi sgt, %8, %289 : vector<8x1xi32>
    %291 = vector.shape_cast %290 : vector<8x1xi1> to vector<8x1xi1>
    %292 = vector.broadcast %291 : vector<8x1xi1> to vector<8x128xi1>
    %293 = arith.select %292, %286, %245 : vector<8x128xi1>, vector<8x128xf32>
    %294 = vector.shape_cast %290 : vector<8x1xi1> to vector<8x1xi1>
    %295 = vector.broadcast %294 : vector<8x1xi1> to vector<8x128xi1>
    %296 = arith.select %295, %288, %248 : vector<8x128xi1>, vector<8x128xf32>
    %297 = arith.index_cast %252 : i32 to index
    %c0_99 = arith.constant 0 : index
    %298 = vector.load %arg6[%297, %c0_99] : memref<64x128xf32, #tpu.memory_space<vmem>>, vector<8x128xf32>
    tpu.vector_store %arg6[%297, %c0_99], %296 {strides = array<i32>} : memref<64x128xf32, #tpu.memory_space<vmem>>, vector<8x128xf32>,
    %c6_i32 = arith.constant 6 : i32
    %c8_i32_100 = arith.constant 8 : i32
    %299 = arith.muli %c6_i32, %c8_i32_100 : i32
    %300 = tpu.assume_multiple %299, 8 : i32
    %301 = arith.index_cast %300 : i32 to index
    %c0_101 = arith.constant 0 : index
    %302 = vector.load %arg9[%301, %c0_101] : memref<64x512xf32, #tpu.memory_space<vmem>>, vector<8x512xf32>
    %c0_102 = arith.constant 0 : index
    %c0_103 = arith.constant 0 : index
    %303 = vector.load %arg4[%c0_102, %c0_103] : memref<128x512xf32, #tpu.memory_space<vmem>>, vector<128x512xf32>
    %cst_104 = arith.constant dense<0.000000e+00> : vector<8x512xf32>
    %304 = tpu.matmul %296, %303, %cst_104 {dimension_numbers = #tpu.dot_dimension_numbers<[1], [0], [0], [1], [0, 0, 1, 1], [], []>} : vector<8x128xf32>, vector<128x512xf32>, vector<8x512xf32> -> vector<8x512xf32>
    %305 = arith.addf %302, %304 : vector<8x512xf32>
    %306 = vector.extract_strided_slice %305 {offsets = [0, 0], sizes = [8, 128], strides = [1, 1]} : vector<8x512xf32> to vector<8x128xf32>
    %cst_105 = arith.constant 5.000000e-01 : f32
    %307 = vector.broadcast %cst_105 : f32 to vector<8x128xf32>
    %308 = arith.mulf %307, %306 : vector<8x128xf32>
    %309 = math.tanh %308 : vector<8x128xf32>
    %cst_106 = arith.constant 5.000000e-01 : f32
    %310 = vector.broadcast %cst_106 : f32 to vector<8x128xf32>
    %311 = arith.mulf %310, %309 : vector<8x128xf32>
    %cst_107 = arith.constant 5.000000e-01 : f32
    %312 = vector.broadcast %cst_107 : f32 to vector<8x128xf32>
    %313 = arith.addf %311, %312 : vector<8x128xf32>
    %314 = vector.extract_strided_slice %305 {offsets = [0, 128], sizes = [8, 128], strides = [1, 1]} : vector<8x512xf32> to vector<8x128xf32>
    %cst_108 = arith.constant 5.000000e-01 : f32
    %315 = vector.broadcast %cst_108 : f32 to vector<8x128xf32>
    %316 = arith.mulf %315, %314 : vector<8x128xf32>
    %317 = math.tanh %316 : vector<8x128xf32>
    %cst_109 = arith.constant 5.000000e-01 : f32
    %318 = vector.broadcast %cst_109 : f32 to vector<8x128xf32>
    %319 = arith.mulf %318, %317 : vector<8x128xf32>
    %cst_110 = arith.constant 5.000000e-01 : f32
    %320 = vector.broadcast %cst_110 : f32 to vector<8x128xf32>
    %321 = arith.addf %319, %320 : vector<8x128xf32>
    %322 = vector.extract_strided_slice %305 {offsets = [0, 256], sizes = [8, 128], strides = [1, 1]} : vector<8x512xf32> to vector<8x128xf32>
    %323 = math.tanh %322 : vector<8x128xf32>
    %324 = vector.extract_strided_slice %305 {offsets = [0, 384], sizes = [8, 128], strides = [1, 1]} : vector<8x512xf32> to vector<8x128xf32>
    %cst_111 = arith.constant 5.000000e-01 : f32
    %325 = vector.broadcast %cst_111 : f32 to vector<8x128xf32>
    %326 = arith.mulf %325, %324 : vector<8x128xf32>
    %327 = math.tanh %326 : vector<8x128xf32>
    %cst_112 = arith.constant 5.000000e-01 : f32
    %328 = vector.broadcast %cst_112 : f32 to vector<8x128xf32>
    %329 = arith.mulf %328, %327 : vector<8x128xf32>
    %cst_113 = arith.constant 5.000000e-01 : f32
    %330 = vector.broadcast %cst_113 : f32 to vector<8x128xf32>
    %331 = arith.addf %329, %330 : vector<8x128xf32>
    %332 = arith.mulf %321, %293 : vector<8x128xf32>
    %333 = arith.mulf %313, %323 : vector<8x128xf32>
    %334 = arith.addf %332, %333 : vector<8x128xf32>
    %335 = math.tanh %334 : vector<8x128xf32>
    %336 = arith.mulf %331, %335 : vector<8x128xf32>
    %337 = vector.broadcast %c6_i32 : i32 to vector<8x1xi32>
    %338 = arith.cmpi sgt, %8, %337 : vector<8x1xi32>
    %339 = vector.shape_cast %338 : vector<8x1xi1> to vector<8x1xi1>
    %340 = vector.broadcast %339 : vector<8x1xi1> to vector<8x128xi1>
    %341 = arith.select %340, %334, %293 : vector<8x128xi1>, vector<8x128xf32>
    %342 = vector.shape_cast %338 : vector<8x1xi1> to vector<8x1xi1>
    %343 = vector.broadcast %342 : vector<8x1xi1> to vector<8x128xi1>
    %344 = arith.select %343, %336, %296 : vector<8x128xi1>, vector<8x128xf32>
    %345 = arith.index_cast %300 : i32 to index
    %c0_114 = arith.constant 0 : index
    %346 = vector.load %arg6[%345, %c0_114] : memref<64x128xf32, #tpu.memory_space<vmem>>, vector<8x128xf32>
    tpu.vector_store %arg6[%345, %c0_114], %344 {strides = array<i32>} : memref<64x128xf32, #tpu.memory_space<vmem>>, vector<8x128xf32>,
    %c7_i32 = arith.constant 7 : i32
    %c8_i32_115 = arith.constant 8 : i32
    %347 = arith.muli %c7_i32, %c8_i32_115 : i32
    %348 = tpu.assume_multiple %347, 8 : i32
    %349 = arith.index_cast %348 : i32 to index
    %c0_116 = arith.constant 0 : index
    %350 = vector.load %arg9[%349, %c0_116] : memref<64x512xf32, #tpu.memory_space<vmem>>, vector<8x512xf32>
    %c0_117 = arith.constant 0 : index
    %c0_118 = arith.constant 0 : index
    %351 = vector.load %arg4[%c0_117, %c0_118] : memref<128x512xf32, #tpu.memory_space<vmem>>, vector<128x512xf32>
    %cst_119 = arith.constant dense<0.000000e+00> : vector<8x512xf32>
    %352 = tpu.matmul %344, %351, %cst_119 {dimension_numbers = #tpu.dot_dimension_numbers<[1], [0], [0], [1], [0, 0, 1, 1], [], []>} : vector<8x128xf32>, vector<128x512xf32>, vector<8x512xf32> -> vector<8x512xf32>
    %353 = arith.addf %350, %352 : vector<8x512xf32>
    %354 = vector.extract_strided_slice %353 {offsets = [0, 0], sizes = [8, 128], strides = [1, 1]} : vector<8x512xf32> to vector<8x128xf32>
    %cst_120 = arith.constant 5.000000e-01 : f32
    %355 = vector.broadcast %cst_120 : f32 to vector<8x128xf32>
    %356 = arith.mulf %355, %354 : vector<8x128xf32>
    %357 = math.tanh %356 : vector<8x128xf32>
    %cst_121 = arith.constant 5.000000e-01 : f32
    %358 = vector.broadcast %cst_121 : f32 to vector<8x128xf32>
    %359 = arith.mulf %358, %357 : vector<8x128xf32>
    %cst_122 = arith.constant 5.000000e-01 : f32
    %360 = vector.broadcast %cst_122 : f32 to vector<8x128xf32>
    %361 = arith.addf %359, %360 : vector<8x128xf32>
    %362 = vector.extract_strided_slice %353 {offsets = [0, 128], sizes = [8, 128], strides = [1, 1]} : vector<8x512xf32> to vector<8x128xf32>
    %cst_123 = arith.constant 5.000000e-01 : f32
    %363 = vector.broadcast %cst_123 : f32 to vector<8x128xf32>
    %364 = arith.mulf %363, %362 : vector<8x128xf32>
    %365 = math.tanh %364 : vector<8x128xf32>
    %cst_124 = arith.constant 5.000000e-01 : f32
    %366 = vector.broadcast %cst_124 : f32 to vector<8x128xf32>
    %367 = arith.mulf %366, %365 : vector<8x128xf32>
    %cst_125 = arith.constant 5.000000e-01 : f32
    %368 = vector.broadcast %cst_125 : f32 to vector<8x128xf32>
    %369 = arith.addf %367, %368 : vector<8x128xf32>
    %370 = vector.extract_strided_slice %353 {offsets = [0, 256], sizes = [8, 128], strides = [1, 1]} : vector<8x512xf32> to vector<8x128xf32>
    %371 = math.tanh %370 : vector<8x128xf32>
    %372 = vector.extract_strided_slice %353 {offsets = [0, 384], sizes = [8, 128], strides = [1, 1]} : vector<8x512xf32> to vector<8x128xf32>
    %cst_126 = arith.constant 5.000000e-01 : f32
    %373 = vector.broadcast %cst_126 : f32 to vector<8x128xf32>
    %374 = arith.mulf %373, %372 : vector<8x128xf32>
    %375 = math.tanh %374 : vector<8x128xf32>
    %cst_127 = arith.constant 5.000000e-01 : f32
    %376 = vector.broadcast %cst_127 : f32 to vector<8x128xf32>
    %377 = arith.mulf %376, %375 : vector<8x128xf32>
    %cst_128 = arith.constant 5.000000e-01 : f32
    %378 = vector.broadcast %cst_128 : f32 to vector<8x128xf32>
    %379 = arith.addf %377, %378 : vector<8x128xf32>
    %380 = arith.mulf %369, %341 : vector<8x128xf32>
    %381 = arith.mulf %361, %371 : vector<8x128xf32>
    %382 = arith.addf %380, %381 : vector<8x128xf32>
    %383 = math.tanh %382 : vector<8x128xf32>
    %384 = arith.mulf %379, %383 : vector<8x128xf32>
    %385 = vector.broadcast %c7_i32 : i32 to vector<8x1xi32>
    %386 = arith.cmpi sgt, %8, %385 : vector<8x1xi32>
    %387 = vector.shape_cast %386 : vector<8x1xi1> to vector<8x1xi1>
    %388 = vector.broadcast %387 : vector<8x1xi1> to vector<8x128xi1>
    %389 = arith.select %388, %382, %341 : vector<8x128xi1>, vector<8x128xf32>
    %390 = vector.shape_cast %386 : vector<8x1xi1> to vector<8x1xi1>
    %391 = vector.broadcast %390 : vector<8x1xi1> to vector<8x128xi1>
    %392 = arith.select %391, %384, %344 : vector<8x128xi1>, vector<8x128xf32>
    %393 = arith.index_cast %348 : i32 to index
    %c0_129 = arith.constant 0 : index
    %394 = vector.load %arg6[%393, %c0_129] : memref<64x128xf32, #tpu.memory_space<vmem>>, vector<8x128xf32>
    tpu.vector_store %arg6[%393, %c0_129], %392 {strides = array<i32>} : memref<64x128xf32, #tpu.memory_space<vmem>>, vector<8x128xf32>,
    %c8_i32_130 = arith.constant 8 : i32
    %c0_131 = arith.constant 0 : index
    %c0_132 = arith.constant 0 : index
    %395 = vector.load %arg7[%c0_131, %c0_132] : memref<8x128xf32, #tpu.memory_space<vmem>>, vector<8x128xf32>
    tpu.vector_store %arg7[%c0_131, %c0_132], %392 {strides = array<i32>} : memref<8x128xf32, #tpu.memory_space<vmem>>, vector<8x128xf32>,
    %c0_133 = arith.constant 0 : index
    %c0_134 = arith.constant 0 : index
    %396 = vector.load %arg8[%c0_133, %c0_134] : memref<8x128xf32, #tpu.memory_space<vmem>>, vector<8x128xf32>
    tpu.vector_store %arg8[%c0_133, %c0_134], %389 {strides = array<i32>} : memref<8x128xf32, #tpu.memory_space<vmem>>, vector<8x128xf32>,
    return
  }
  func.func @transform_0(%arg0: i32) -> (i32, i32) {
    %c0_i32 = arith.constant 0 : i32
    %c0_i32_0 = arith.constant 0 : i32
    %c0_i32_1 = arith.constant 0 : i32
    return %c0_i32, %c0_i32_0 : i32, i32
  }
  func.func @transform_1(%arg0: i32) -> (i32, i32) {
    %c0_i32 = arith.constant 0 : i32
    %c0_i32_0 = arith.constant 0 : i32
    %c0_i32_1 = arith.constant 0 : i32
    return %c0_i32, %c0_i32_0 : i32, i32
  }
  func.func @transform_2(%arg0: i32) -> (i32, i32) {
    %c0_i32 = arith.constant 0 : i32
    %c0_i32_0 = arith.constant 0 : i32
    %c0_i32_1 = arith.constant 0 : i32
    return %c0_i32, %c0_i32_0 : i32, i32
  }
  func.func @transform_3(%arg0: i32) -> (i32, i32) {
    %c0_i32 = arith.constant 0 : i32
    %c0_i32_0 = arith.constant 0 : i32
    %c0_i32_1 = arith.constant 0 : i32
    return %c0_i32, %c0_i32_0 : i32, i32
  }
  func.func @transform_4(%arg0: i32) -> (i32, i32) {
    %c0_i32 = arith.constant 0 : i32
    %c0_i32_0 = arith.constant 0 : i32
    %c0_i32_1 = arith.constant 0 : i32
    return %c0_i32, %c0_i32_0 : i32, i32
  }
  func.func @transform_5(%arg0: i32) -> (i32, i32) {
    %c0_i32 = arith.constant 0 : i32
    %c0_i32_0 = arith.constant 0 : i32
    %c0_i32_1 = arith.constant 0 : i32
    return %c0_i32, %c0_i32_0 : i32, i32
  }
  func.func @transform_6(%arg0: i32) -> (i32, i32) {
    %c0_i32 = arith.constant 0 : i32
    %c0_i32_0 = arith.constant 0 : i32
    %c0_i32_1 = arith.constant 0 : i32
    return %c0_i32, %c0_i32_0 : i32, i32
  }
  func.func @transform_7(%arg0: i32) -> (i32, i32) {
    %c0_i32 = arith.constant 0 : i32
    %c0_i32_0 = arith.constant 0 : i32
    %c0_i32_1 = arith.constant 0 : i32
    return %c0_i32, %c0_i32_0 : i32, i32
  }
}

</mosaic_0001>

<bundles_post_ra>
// kernel: tpu_custom_call.1
= control target key start
LH: loop header
LB: loop body
LE: loop exit
PB: predicated region body
PF: predicated region fallthrough
CT: control target
= control target key end

     0   :  { %13 = vsyncpa [#allocation4], 0  ;;  %s3750_s0 = inlined_call_operand.vmem [shape: f32[64,16], index: 0, kind: input, shape index: {}]   ;;  %s3751_s1 = inlined_call_operand.vmem [shape: s32[8,1], index: 1, kind: input, shape index: {}]   ;;  %s3752_s2 = inlined_call_operand.vmem [shape: bf16[16,512], index: 2, kind: input, shape index: {}]   ;;  %s3753_s3 = inlined_call_operand.hbm [shape: f32[128,512], index: 3, kind: input, shape index: {}]   ;;  %s3754_s4 = inlined_call_operand.vmem [shape: f32[1,512], index: 4, kind: input, shape index: {}]   ;;  %s3755_s5 = inlined_call_operand.hbm [shape: f32[64,128], index: 5, kind: output, shape index: {0}]   ;;  %s3756_s6 = inlined_call_operand.hbm [shape: f32[8,128], index: 6, kind: output, shape index: {1}]   ;;  %s3757_s7 = inlined_call_operand.hbm [shape: f32[8,128], index: 7, kind: output, shape index: {2}]  }
   0x1   :  { %14 = vsyncpa [#allocation5], 0 }
   0x2   :  { %15 = vsyncpa [#allocation8], 0  ;;  %s3020_s24 = smov [#allocation3]   ;;  %s2926_s28 = scalar_lea.hbm %s3753_s3, 8192 }
   0x3   :  { %s27_s25 = sshll.u32 %s3020_s24, 4  ;;  %p2927_p0 = scmp.ne.s32.totalorder %s3753_s3, %s2926_s28  ;;  %s28_s25 = int_to_ptr.vmem [resolvable:$true] %s27_s25 }
   0x4   :  { %p2930_p1 = scmp.lt.u32.totalorder %s2926_s28, %s3753_s3 }
   0x6   :  { %p2932_p2 = pnand %p2930_p1, %p2927_p0 }
   0x8   :  { %2935 = shalt.err (!%p2932_p2)
}
   0x9   :  { %s2936_s10 = scalar_lea.vmem %s28_s25, 8192  ;;  %p2941_p4 = scmp.lt.s32.totalorder %s28_s25, %s28_s25 }
   0xa   :  { %p2937_p3 = scmp.ne.s32.totalorder %s28_s25, %s2936_s10  ;;  %p2942_p5 = scmp.lt.s32.totalorder %s2936_s10, %s2936_s10 }
   0xc   :  { %p2943_p6 = por %p2942_p5, %p2941_p4 }
   0xe   :  { %p2944_p7 = pnand %p2943_p6, %p2937_p3 }
  0x10   :  { %2947 = shalt.err (!%p2944_p7)
}
  0x11   :  { %s3021_s11 = smov 512   ;;  %s3022_s12 = smov 32  }
  0x12   :  { %33 = dma.hbm_to_vmem [thread:$0]  %s3753_s3, 8192, %s28_s25, [#allocation4], %s3021_s11, %s3021_s11, %s3022_s12  }
  0x13   :  { %3014 = dma.done.wait [#allocation4], 8192  }
  0x14   :  { %3015 = vsyncadd [#allocation4], 4294959104  ;;  %v3758_v0 = vmov 0   ;;  %v2840_v1 = vld [vmem:[%s3752_s2 + $0x4] ss:$16 sps:$4 sm:$0xff]   ;;  %v41_v6 = vld [vmem:[%s3750_s0 + $0x8] sm:$0xff] }
  0x15   :  { %143 = vmatprep.mubr.bf16.mxu0 %v3758_v0  ;;  %216 = vmatprep.mubr.bf16.mxu1 %v3758_v0  ;;  %v2842_v2 = vld [vmem:[%s3752_s2 + $0xc] ss:$16 sps:$4 sm:$0xff]   ;;  %v2844_v3 = vld [vmem:[%s3752_s2] ss:$16 sps:$4 sm:$0xff]   ;;  %v2845_v4 = vld [vmem:[%s3752_s2 + $0x8] ss:$16 sps:$4 sm:$0xff]  }
  0x16   :  { %2838 = vset.pattern.permute.xlu0 %v3758_v0  ;;  %2839 = vset.pattern.permute.xlu1 %v3758_v0  ;;  %v40_v5 = vld [vmem:[%s3750_s0] sm:$0xff]  ;;  %v298_v7 = vld [vmem:[#allocation3 + $0x8] sm:$0xff]  ;;  %vm98_vm0 = vcmask 130048   ;;  %v300_v11 = vld [vmem:[#allocation3 + $0x18] sm:$0xff]  ;;  %s3026_s17 = smov [#allocation6]   ;;  %s3027_s3 = smov [#allocation9]  }
  0x17   :  { %111 = vmatprep.subr.bf16.mxu0 %v2840_v1  ;;  %184 = vmatprep.subr.bf16.mxu1 %v2842_v2  ;;  %v302_v8 = vld [vmem:[#allocation3 + $0x28] sm:$0xff]  ;;  %v48_v9 = vpack.c.bf16 %v41_v6, %v40_v5  ;;  %v304_v12 = vld [vmem:[#allocation3 + $0x38] sm:$0xff]  ;;  %v297_v13 = vld [vmem:[#allocation3] sm:$0xff]  ;;  %s2256_s18 = sshll.u32 %s3026_s17, 4  ;;  %s2279_s19 = sshll.u32 %s3027_s3, 4  ;;  %s3699_s18 = int_to_ptr.vmem [resolvable:$true] %s2256_s18  ;;  %s3702_s19 = int_to_ptr.vmem [resolvable:$true] %s2279_s19 }
  0x18   :  { %112 = vmatpush1.bf16.msra.mxu0 %v2844_v3  ;;  %185 = vmatpush1.bf16.msra.mxu1 %v2845_v4  ;;  %v3104_v10 = vpack.c.bf16 %v302_v8, %v298_v7  ;;  %v3106_v14 = vpack.c.bf16 %v304_v12, %v300_v11  ;;  %v301_v15 = vld [vmem:[#allocation3 + $0x20] sm:$0xff]  ;;  %v299_v16 = vld [vmem:[#allocation3 + $0x10] sm:$0xff]  ;;  %v306_v20 = vld [vmem:[#allocation3 + $0x48] sm:$0xff] }
  0x19   :  { %v303_v17 = vld [vmem:[#allocation3 + $0x30] sm:$0xff]  ;;  %v3109_v18 = vpack.c.bf16 %v301_v15, %v297_v13  ;;  %v310_v21 = vld [vmem:[#allocation3 + $0x68] sm:$0xff]  ;;  %v308_v22 = vld [vmem:[#allocation3 + $0x58] sm:$0xff] }
  0x1a   :  { %2317 = vmatprep.subr.bf16.mxu0 %v3104_v10  ;;  %v3111_v19 = vpack.c.bf16 %v303_v17, %v299_v16  ;;  %v3115_v23 = vpack.c.bf16 %v310_v21, %v306_v20  ;;  %v312_v24 = vld [vmem:[#allocation3 + $0x78] sm:$0xff]  ;;  %v305_v25 = vld [vmem:[#allocation3 + $0x40] sm:$0xff]  ;;  %2349 = vmatprep.subr.bf16.mxu1 %v3106_v14  ;;  %v307_v29 = vld [vmem:[#allocation3 + $0x50] sm:$0xff] }
  0x1b   :  { %2306 = vmatmul.mubr.msk.bf16.vlgmr.msra.gmra.mrb[0].mxu0 %vm98_vm0, %v48_v9  ;;  %2310 = vmatmul.mubr.msk.bf16.vlgmr.msra.gmra.mrb[0].mxu1 %vm98_vm0, %v48_v9  ;;  %v309_v26 = vld [vmem:[#allocation3 + $0x60] sm:$0xff]  ;;  %v3119_v27 = vpack.c.bf16 %v312_v24, %v308_v22  ;;  %v311_v30 = vld [vmem:[#allocation3 + $0x70] sm:$0xff]  ;;  %v43_v33 = vld [vmem:[%s3750_s0 + $0x18] sm:$0xff] }
  0x1c   :  { %2319 = vmatpush1.bf16.msra.mxu0 %v3109_v18  ;;  %v3121_v28 = vpack.c.bf16 %v309_v26, %v305_v25  ;;  %v42_v31 = vld [vmem:[%s3750_s0 + $0x10] sm:$0xff]  ;;  %2351 = vmatpush1.bf16.msra.mxu1 %v3111_v19  ;;  %v3128_v32 = vpack.c.bf16 %v311_v30, %v307_v29  ;;  %v314_v34 = vld [vmem:[#allocation3 + $0x88] sm:$0xff]  ;;  %v316_v37 = vld [vmem:[#allocation3 + $0x98] sm:$0xff] }
  0x1d   :  { %2321 = vmatprep.subr.bf16.mxu0 %v3115_v23  ;;  %v318_v35 = vld [vmem:[#allocation3 + $0xa8] sm:$0xff]  ;;  %2353 = vmatprep.subr.bf16.mxu1 %v3119_v27  ;;  %v320_v38 = vld [vmem:[#allocation3 + $0xb8] sm:$0xff]  ;;  %v313_v39 = vld [vmem:[#allocation3 + $0x80] sm:$0xff]  ;;  %v49_v40 = vpack.c.bf16 %v43_v33, %v42_v31 }
  0x1e   :  { %153 = vmatprep.mubr.bf16.mxu0 %v3758_v0  ;;  %v3135_v36 = vpack.c.bf16 %v318_v35, %v314_v34  ;;  %226 = vmatprep.mubr.bf16.mxu1 %v3758_v0  ;;  %v3138_v41 = vpack.c.bf16 %v320_v38, %v316_v37  ;;  %v317_v42 = vld [vmem:[#allocation3 + $0xa0] sm:$0xff]  ;;  %v315_v43 = vld [vmem:[#allocation3 + $0x90] sm:$0xff]  ;;  %v322_v46 = vld [vmem:[#allocation3 + $0xc8] sm:$0xff] }
  0x1f   :  { %v319_v44 = vld [vmem:[#allocation3 + $0xb0] sm:$0xff]  ;;  %v3141_v45 = vpack.c.bf16 %v317_v42, %v313_v39  ;;  %v326_v47 = vld [vmem:[#allocation3 + $0xe8] sm:$0xff]  ;;  %v324_v48 = vld [vmem:[#allocation3 + $0xd8] sm:$0xff] }
  0x20   :  { %2323 = vmatpush1.bf16.msra.mxu0 %v3121_v28  ;;  %2355 = vmatpush1.bf16.msra.mxu1 %v3128_v32  ;;  %v3145_v49 = vpack.c.bf16 %v319_v44, %v315_v43  ;;  %v3147_v50 = vpack.c.bf16 %v326_v47, %v322_v46  ;;  %v328_v51 = vld [vmem:[#allocation3 + $0xf8] sm:$0xff]  ;;  %v321_v52 = vld [vmem:[#allocation3 + $0xc0] sm:$0xff]  ;;  %v323_v55 = vld [vmem:[#allocation3 + $0xd0] sm:$0xff] }
  0x21   :  { %2325 = vmatprep.subr.bf16.mxu0 %v3135_v36  ;;  %v325_v53 = vld [vmem:[#allocation3 + $0xe0] sm:$0xff]  ;;  %2357 = vmatprep.subr.bf16.mxu1 %v3138_v41  ;;  %v3150_v54 = vpack.c.bf16 %v328_v51, %v324_v48  ;;  %v327_v56 = vld [vmem:[#allocation3 + $0xf0] sm:$0xff]  ;;  %v330_v58 = vld [vmem:[#allocation3 + $0x108] sm:$0xff] }
  0x22   :  { %v44_v57 = vld [vmem:[%s3750_s0 + $0x20] sm:$0xff]  ;;  %v334_v59 = vld [vmem:[#allocation3 + $0x128] sm:$0xff]  ;;  %v3158_v60 = vpack.c.bf16 %v325_v53, %v321_v52  ;;  %v332_v62 = vld [vmem:[#allocation3 + $0x118] sm:$0xff]  ;;  %v3166_v1 = vpack.c.bf16 %v327_v56, %v323_v55 }
  0x23   :  { %2307 = vmatmul.mubr.msk.bf16.gmra.mrb[4].mxu0 %vm98_vm0, %v49_v40  ;;  %2311 = vmatmul.mubr.msk.bf16.gmra.mrb[4].mxu1 %vm98_vm0, %v49_v40  ;;  %v45_v61 = vld [vmem:[%s3750_s0 + $0x28] sm:$0xff]  ;;  %v336_v63 = vld [vmem:[#allocation3 + $0x138] sm:$0xff]  ;;  %v3168_v2 = vpack.c.bf16 %v334_v59, %v330_v58  ;;  %v329_v3 = vld [vmem:[#allocation3 + $0x100] sm:$0xff] }
  0x24   :  { %2327 = vmatpush1.bf16.msra.mxu0 %v3141_v45  ;;  %163 = vmatprep.mubr.bf16.mxu0 %v3758_v0  ;;  %v333_v4 = vld [vmem:[#allocation3 + $0x120] sm:$0xff]  ;;  %v331_v5 = vld [vmem:[#allocation3 + $0x110] sm:$0xff]  ;;  %v3172_v6 = vpack.c.bf16 %v336_v63, %v332_v62  ;;  %v338_v8 = vld [vmem:[#allocation3 + $0x148] sm:$0xff]  ;;  %v50_v11 = vpack.c.bf16 %v45_v61, %v44_v57 }
  0x25   :  { %2359 = vmatpush1.bf16.msra.mxu1 %v3145_v49  ;;  %2329 = vmatprep.subr.bf16.mxu0 %v3147_v50  ;;  %v335_v7 = vld [vmem:[#allocation3 + $0x130] sm:$0xff]  ;;  %v342_v9 = vld [vmem:[#allocation3 + $0x168] sm:$0xff]  ;;  %v340_v12 = vld [vmem:[#allocation3 + $0x158] sm:$0xff]  ;;  %v3175_v15 = vpack.c.bf16 %v333_v4, %v329_v3 }
  0x26   :  { %2361 = vmatprep.subr.bf16.mxu1 %v3150_v54  ;;  %236 = vmatprep.mubr.bf16.mxu1 %v3758_v0  ;;  %v344_v13 = vld [vmem:[#allocation3 + $0x178] sm:$0xff]  ;;  %v3179_v16 = vpack.c.bf16 %v335_v7, %v331_v5  ;;  %v3181_v17 = vpack.c.bf16 %v342_v9, %v338_v8  ;;  %v337_v20 = vld [vmem:[#allocation3 + $0x140] sm:$0xff]  ;;  %v339_v22 = vld [vmem:[#allocation3 + $0x150] sm:$0xff]  ;;  %v3760_v5 = vmov 0.0  }
  0x27   :  { %v341_v21 = vld [vmem:[#allocation3 + $0x160] sm:$0xff]  ;;  %v3184_v24 = vpack.c.bf16 %v344_v13, %v340_v12  ;;  %v343_v25 = vld [vmem:[#allocation3 + $0x170] sm:$0xff]  ;;  %v346_v26 = vld [vmem:[#allocation3 + $0x188] sm:$0xff]  ;;  %v58_v12 = vlaneseq }
  0x28   :  { %2331 = vmatpush1.bf16.msra.mxu0 %v3158_v60  ;;  %v350_v29 = vld [vmem:[#allocation3 + $0x1a8] sm:$0xff]  ;;  %v348_v30 = vld [vmem:[#allocation3 + $0x198] sm:$0xff]  ;;  %v3189_v33 = vpack.c.bf16 %v341_v21, %v337_v20  ;;  %v46_v34 = vld [vmem:[%s3750_s0 + $0x30] sm:$0xff]  ;;  %v3200_v38 = vpack.c.bf16 %v343_v25, %v339_v22 }
  0x29   :  { %2363 = vmatpush1.bf16.msra.mxu1 %v3166_v1  ;;  %2333 = vmatprep.subr.bf16.mxu0 %v3168_v2  ;;  %v352_v31 = vld [vmem:[#allocation3 + $0x1b8] sm:$0xff]  ;;  %v345_v37 = vld [vmem:[#allocation3 + $0x180] sm:$0xff]  ;;  %v3202_v39 = vpack.c.bf16 %v350_v29, %v346_v26  ;;  %v347_v42 = vld [vmem:[#allocation3 + $0x190] sm:$0xff]  ;;  %v59_v13 = vshrl.u32 %v58_v12, 7 }
  0x2a   :  { %2365 = vmatprep.subr.bf16.mxu1 %v3172_v6  ;;  %v47_v35 = vld [vmem:[%s3750_s0 + $0x38] sm:$0xff]  ;;  %v349_v40 = vld [vmem:[#allocation3 + $0x1a0] sm:$0xff]  ;;  %v351_v43 = vld [vmem:[#allocation3 + $0x1b0] sm:$0xff]  ;;  %v3206_v44 = vpack.c.bf16 %v352_v31, %v348_v30 }
  0x2b   :  { %2308 = vmatmul.mubr.msk.bf16.gmra.mrb[8].mxu0 %vm98_vm0, %v50_v11  ;;  %2312 = vmatmul.mubr.msk.bf16.gmra.mrb[8].mxu1 %vm98_vm0, %v50_v11  ;;  %v354_v46 = vld [vmem:[#allocation3 + $0x1c8] sm:$0xff]  ;;  %v3211_v48 = vld [vmem:[%s3751_s1] sm:$0xff]  ;;  %v51_v51 = vpack.c.bf16 %v47_v35, %v46_v34  ;;  %v356_v52 = vld [vmem:[#allocation3 + $0x1d8] sm:$0xff]  ;;  %v3215_v55 = vpack.c.bf16 %v349_v40, %v345_v37  ;;  %v3220_v57 = vpack.c.bf16 %v351_v43, %v347_v42  ;;  %v68_v20 = vsub.s32 2, %v59_v13 }
  0x2c   :  { %2335 = vmatpush1.bf16.msra.mxu0 %v3175_v15  ;;  %173 = vmatprep.mubr.bf16.mxu0 %v3758_v0  ;;  %v358_v47 = vld [vmem:[#allocation3 + $0x1e8] sm:$0xff]  ;;  %v360_v53 = vld [vmem:[#allocation3 + $0x1f8] sm:$0xff]  ;;  %vm525_vm1 = vcmp.gt.s32.totalorder %v3211_v48, 0  ;;  %v353_v59 = vld [vmem:[#allocation3 + $0x1c0] sm:$0xff]  ;;  %vm769_vm2 = vcmp.gt.s32.totalorder %v3211_v48, 1  ;;  %vm1504_vm3 = vcmp.gt.s32.totalorder %v3211_v48, 4 }
  0x2d   :  { %2367 = vmatpush1.bf16.msra.mxu1 %v3179_v16  ;;  %2337 = vmatprep.subr.bf16.mxu0 %v3181_v17  ;;  %v526_v56 = vsel %vm525_vm1, 1, %v3758_v0  ;;  %v3222_v58 = vpack.c.bf16 %v358_v47, %v354_v46  ;;  %v357_v61 = vld [vmem:[#allocation3 + $0x1e0] sm:$0xff]  ;;  %v3226_v62 = vpack.c.bf16 %v360_v53, %v356_v52  ;;  %v355_v63 = vld [vmem:[#allocation3 + $0x1d0] sm:$0xff]  ;;  %v770_v7 = vsel %vm769_vm2, 1, %v3758_v0 }
  0x2e   :  { %2369 = vmatprep.subr.bf16.mxu1 %v3184_v24  ;;  %246 = vmatprep.mubr.bf16.mxu1 %v3758_v0  ;;  %v359_v3 = vld [vmem:[#allocation3 + $0x1f0] sm:$0xff]  ;;  %v3231_v4 = vpack.c.bf16 %v357_v61, %v353_v59  ;;  %v1505_v9 = vsel %vm1504_vm3, 1, %v3758_v0  ;;  %vm1994_vm4 = vcmp.gt.s32.totalorder %v3211_v48, 6  ;;  %v72_v21 = vsub.s32 3, %v59_v13  ;;  %v56_v25 = vld [vmem:[%s3754_s4] sm:$0xf] }
  0x2f   :  { %528 = vperm.xlu0 %2838, %v526_v56   ;;  %v3237_v8 = vpack.c.bf16 %v359_v3, %v355_v63  ;;  %v1995_v11 = vsel %vm1994_vm4, 1, %v3758_v0  ;;  %v60_v22 = vsub.s32 0, %v59_v13  ;;  %v64_v26 = vsub.s32 1, %v59_v13  ;;  %s3025_s4 = smov [#allocation7]  }
  0x30   :  { %2339 = vmatpush1.bf16.msra.mxu0 %v3189_v33  ;;  %v3288_v29 = vrot.slane %v56_v25, %v68_v20  ;;  %v3294_v34 = vrot.slane %v56_v25, %v72_v21  ;;  %vm1014_vm6 = vcmp.gt.s32.totalorder %v3211_v48, 2  ;;  %vm1259_vm7 = vcmp.gt.s32.totalorder %v3211_v48, 3  ;;  %s2269_s16 = sshll.u32 %s3025_s4, 4  ;;  %s2270_s16 = int_to_ptr.vmem [resolvable:$true] %s2269_s16 }
  0x31   :  { %2371 = vmatpush1.bf16.msra.mxu1 %v3200_v38  ;;  %2341 = vmatprep.subr.bf16.mxu0 %v3202_v39  ;;  %v65_v37 = vrot.slane %v56_v25, %v64_v26  ;;  %vm1749_vm8 = vcmp.gt.s32.totalorder %v3211_v48, 5  ;;  %vm2239_vm9 = vcmp.gt.s32.totalorder %v3211_v48, 7  ;;  %s2948_s20 = scalar_lea.vmem %s2270_s16, 128  ;;  %p2953_p9 = scmp.lt.s32.totalorder %s2270_s16, %s2270_s16 }
  0x32   :  { %2373 = vmatprep.subr.bf16.mxu1 %v3206_v44  ;;  %p2949_p8 = scmp.ne.s32.totalorder %s2270_s16, %s2948_s20  ;;  %p2954_p10 = scmp.lt.s32.totalorder %s2948_s20, %s2948_s20 }
  0x33   :  { %2309 = vmatmul.mubr.msk.bf16.gmra.mrb[12].mxu0 %vm98_vm0, %v51_v51  ;;  %2313 = vmatmul.mubr.msk.bf16.gmra.mrb[12].mxu1 %vm98_vm0, %v51_v51 }
  0x34   :  { %2343 = vmatpush1.bf16.msra.mxu0 %v3215_v55  ;;  %425 = vmatprep.mubr.f32.mxu0 %v3760_v5  ;;  %p2955_p11 = por %p2954_p10, %p2953_p9 }
  0x35   :  { %2375 = vmatpush1.bf16.msra.mxu1 %v3220_v57  ;;  %2345 = vmatprep.subr.bf16.mxu0 %v3222_v58 }
  0x36   :  { %2377 = vmatprep.subr.bf16.mxu1 %v3226_v62  ;;  %496 = vmatprep.mubr.f32.mxu1 %v3760_v5  ;;  %p2956_p12 = pnand %p2955_p11, %p2949_p8 }
  0x37   :  { %772 = vperm.xlu0 %2838, %v770_v7  }
  0x38   :  { %2347 = vmatpush1.bf16.msra.mxu0 %v3231_v4 }
  0x39   :  { %2379 = vmatpush1.bf16.msra.mxu1 %v3237_v8  ;;  %2381 = vmatprep.subr.bf16.mxu0 %v3104_v10 }
  0x3a   :  { %2413 = vmatprep.subr.bf16.mxu1 %v3106_v14 }
  0x3b   :  { %426 = vmatmul.mubr.f32.vlgmr.msra.gmra.mrb[16].mxu0 %v3760_v5  ;;  %1507 = vperm.xlu0 %2838, %v1505_v9  }
  0x3c   :  { %497 = vmatmul.mubr.f32.vlgmr.msra.gmra.mrb[16].mxu1 %v3760_v5  ;;  %2383 = vmatpush1.bf16.msra.mxu0 %v3109_v18 }
  0x3d   :  { %2415 = vmatpush1.bf16.msra.mxu1 %v3111_v19  ;;  %2385 = vmatprep.subr.bf16.mxu0 %v3115_v23 }
  0x3e   :  { %2417 = vmatprep.subr.bf16.mxu1 %v3119_v27  ;;  %669 = vmatprep.mubr.f32.mxu0 %v3760_v5 }
  0x3f   :  { %1997 = vperm.xlu0 %2838, %v1995_v11   ;;  %740 = vmatprep.mubr.f32.mxu1 %v3760_v5 }
  0x40   :  { %2387 = vmatpush1.bf16.msra.mxu0 %v3121_v28 }
  0x41   :  { %2419 = vmatpush1.bf16.msra.mxu1 %v3128_v32  ;;  %2389 = vmatprep.subr.bf16.mxu0 %v3135_v36 }
  0x42   :  { %2421 = vmatprep.subr.bf16.mxu1 %v3138_v41 }
  0x44   :  { %2391 = vmatpush1.bf16.msra.mxu0 %v3141_v45 }
  0x45   :  { %2423 = vmatpush1.bf16.msra.mxu1 %v3145_v49  ;;  %2393 = vmatprep.subr.bf16.mxu0 %v3147_v50 }
  0x46   :  { %2425 = vmatprep.subr.bf16.mxu1 %v3150_v54 }
  0x48   :  { %2395 = vmatpush1.bf16.msra.mxu0 %v3158_v60 }
  0x49   :  { %2427 = vmatpush1.bf16.msra.mxu1 %v3166_v1  ;;  %2397 = vmatprep.subr.bf16.mxu0 %v3168_v2 }
  0x4a   :  { %2429 = vmatprep.subr.bf16.mxu1 %v3172_v6 }
  0x4c   :  { %2399 = vmatpush1.bf16.msra.mxu0 %v3175_v15 }
  0x4d   :  { %2431 = vmatpush1.bf16.msra.mxu1 %v3179_v16  ;;  %2401 = vmatprep.subr.bf16.mxu0 %v3181_v17 }
  0x4e   :  { %2433 = vmatprep.subr.bf16.mxu1 %v3184_v24 }
  0x50   :  { %2403 = vmatpush1.bf16.msra.mxu0 %v3189_v33 }
  0x51   :  { %2435 = vmatpush1.bf16.msra.mxu1 %v3200_v38  ;;  %2405 = vmatprep.subr.bf16.mxu0 %v3202_v39 }
  0x52   :  { %2437 = vmatprep.subr.bf16.mxu1 %v3206_v44 }
  0x54   :  { %2407 = vmatpush1.bf16.msra.mxu0 %v3215_v55 }
  0x55   :  { %2439 = vmatpush1.bf16.msra.mxu1 %v3220_v57  ;;  %2409 = vmatprep.subr.bf16.mxu0 %v3222_v58 }
  0x56   :  { %2441 = vmatprep.subr.bf16.mxu1 %v3226_v62 }
  0x58   :  { %2411 = vmatpush1.bf16.msra.mxu0 %v3231_v4 }
  0x59   :  { %2443 = vmatpush1.bf16.msra.mxu1 %v3237_v8  ;;  %2445 = vmatprep.subr.bf16.mxu0 %v3104_v10  ;;  %v61_v10 = vrot.slane %v56_v25, %v60_v22 }
  0x5a   :  { %2477 = vmatprep.subr.bf16.mxu1 %v3106_v14 }
  0xee   :  { %v3290_v30 = vpop.f32.mrb[0].mxu0  ;;  %v3292_v31 = vpop.f32.mrb[0].mxu1 }
  0xef   :  { %v147_v14 = vpop.f32.mrb[1].mxu0  ;;  %v220_v35 = vpop.f32.mrb[1].mxu1 }
  0xf0   :  { %v149_v40 = vpop.f32.mrb[2].mxu0  ;;  %v222_v42 = vpop.f32.mrb[2].mxu1 }
  0xf1   :  { %v3296_v43 = vadd.f32 %v149_v40, %v61_v10  ;;  %v151_v46 = vpop.f32.mrb[3].mxu0  ;;  %v3299_v47 = vadd.f32 %v222_v42, %v3288_v29  ;;  %v224_v51 = vpop.f32.mrb[3].mxu1 }
  0xf2   :  { %v3301_v52 = vadd.f32 %v151_v46, %v65_v37  ;;  %v3304_v53 = vadd.f32 %v224_v51, %v3294_v34 }
  0xf6   :  { %v155_v56 = vpop.f32.mrb[4].mxu0  ;;  %v228_v59 = vpop.f32.mrb[4].mxu1 }
  0xf7   :  { %v3306_v61 = vadd.f32 %v155_v56, %v61_v10  ;;  %v157_v63 = vpop.f32.mrb[5].mxu0  ;;  %v3309_v3 = vadd.f32 %v228_v59, %v3288_v29  ;;  %v230_v7 = vpop.f32.mrb[5].mxu1 }
  0xf8   :  { %v3311_v9 = vadd.f32 %v157_v63, %v65_v37  ;;  %v159_v11 = vpop.f32.mrb[6].mxu0  ;;  %v3314_v12 = vadd.f32 %v230_v7, %v3294_v34  ;;  %v232_v13 = vpop.f32.mrb[6].mxu1 }
  0xf9   :  { %v3316_v20 = vadd.f32 %v159_v11, %v61_v10  ;;  %v161_v21 = vpop.f32.mrb[7].mxu0  ;;  %v3319_v22 = vadd.f32 %v232_v13, %v3288_v29  ;;  %v234_v25 = vpop.f32.mrb[7].mxu1 }
  0xfa   :  { %v3321_v26 = vadd.f32 %v161_v21, %v65_v37  ;;  %v3324_v40 = vadd.f32 %v234_v25, %v3294_v34 }
  0xfb   :  { %3762 = vst [vmem:[#allocation13_spill] sm:$0xff] %v3319_v22 }
  0xfc   :  { %3763 = vst [vmem:[#allocation14_spill] sm:$0xff] %v3321_v26  ;;  %3764 = vst [vmem:[#allocation15_spill] sm:$0xff] %v3324_v40 }
  0xfe   :  { %v165_v42 = vpop.f32.mrb[8].mxu0  ;;  %v238_v46 = vpop.f32.mrb[8].mxu1 }
  0xff   :  { %v3326_v51 = vadd.f32 %v165_v42, %v61_v10  ;;  %v167_v56 = vpop.f32.mrb[9].mxu0  ;;  %v3329_v59 = vadd.f32 %v238_v46, %v3288_v29  ;;  %v240_v63 = vpop.f32.mrb[9].mxu1 }
 0x100   :  { %v3331_v7 = vadd.f32 %v167_v56, %v65_v37  ;;  %v169_v11 = vpop.f32.mrb[10].mxu0  ;;  %v3334_v13 = vadd.f32 %v240_v63, %v3294_v34  ;;  %v242_v21 = vpop.f32.mrb[10].mxu1 }
 0x101   :  { %3765 = vst [vmem:[#allocation16_spill] sm:$0xff] %v3326_v51  ;;  %3766 = vst [vmem:[#allocation17_spill] sm:$0xff] %v3329_v59  ;;  %v3336_v0 = vadd.f32 %v169_v11, %v61_v10  ;;  %v171_v25 = vpop.f32.mrb[11].mxu0  ;;  %v3339_v5 = vadd.f32 %v242_v21, %v3288_v29  ;;  %v244_v42 = vpop.f32.mrb[11].mxu1 }
 0x102   :  { %3767 = vst [vmem:[#allocation18_spill] sm:$0xff] %v3331_v7  ;;  %3768 = vst [vmem:[#allocation19_spill] sm:$0xff] %v3334_v13  ;;  %v3341_v51 = vadd.f32 %v171_v25, %v65_v37  ;;  %v3344_v46 = vadd.f32 %v244_v42, %v3294_v34 }
 0x103   :  { %3769 = vst [vmem:[#allocation20_spill] sm:$0xff] %v3336_v0  ;;  %3770 = vst [vmem:[#allocation21_spill] sm:$0xff] %v3339_v5 }
 0x104   :  { %3771 = vst [vmem:[#allocation22_spill] sm:$0xff] %v3341_v51  ;;  %3772 = vst [vmem:[#allocation23_spill] sm:$0xff] %v3344_v46 }
 0x106   :  { %v175_v59 = vpop.f32.mrb[12].mxu0  ;;  %v248_v56 = vpop.f32.mrb[12].mxu1 }
 0x107   :  { %v3346_v7 = vadd.f32 %v175_v59, %v61_v10  ;;  %v177_v40 = vpop.f32.mrb[13].mxu0  ;;  %v3349_v63 = vadd.f32 %v248_v56, %v3288_v29  ;;  %v250_v11 = vpop.f32.mrb[13].mxu1 }
 0x108   :  { %v3351_v0 = vadd.f32 %v177_v40, %v65_v37  ;;  %v179_v13 = vpop.f32.mrb[14].mxu0  ;;  %v3354_v21 = vadd.f32 %v250_v11, %v3294_v34  ;;  %v252_v25 = vpop.f32.mrb[14].mxu1  ;;  %v146_v40 = vadd.f32 %v3290_v30, %v61_v10  ;;  %v219_v11 = vadd.f32 %v3292_v31, %v3288_v29 }
 0x109   :  { %3773 = vst [vmem:[#allocation24_spill] sm:$0xff] %v3346_v7  ;;  %3774 = vst [vmem:[#allocation25_spill] sm:$0xff] %v3349_v63  ;;  %v3356_v51 = vadd.f32 %v179_v13, %v61_v10  ;;  %v181_v42 = vpop.f32.mrb[15].mxu0  ;;  %v3359_v46 = vadd.f32 %v252_v25, %v3288_v29  ;;  %v254_v59 = vpop.f32.mrb[15].mxu1  ;;  %v221_v13 = vadd.f32 %v220_v35, %v3294_v34 }
 0x10a   :  { %3775 = vst [vmem:[#allocation26_spill] sm:$0xff] %v3351_v0  ;;  %3776 = vst [vmem:[#allocation27_spill] sm:$0xff] %v3354_v21  ;;  %v3361_v7 = vadd.f32 %v181_v42, %v65_v37  ;;  %v3364_v56 = vadd.f32 %v254_v59, %v3294_v34  ;;  %v148_v0 = vadd.f32 %v147_v14, %v65_v37 }
 0x10b   :  { %3777 = vst [vmem:[#allocation28_spill] sm:$0xff] %v3356_v51  ;;  %3778 = vst [vmem:[#allocation29_spill] sm:$0xff] %v3359_v46 }
 0x10c   :  { %3779 = vst [vmem:[#allocation30_spill] sm:$0xff] %v3361_v7 }
 0x10e   :  { %v427_v21 = vpop.f32.mrb[16].mxu0 }
 0x10f   :  { %v503_v51 = vadd.f32 %v427_v21, %v146_v40  ;;  %v498_v63 = vpop.f32.mrb[16].mxu1  ;;  %v429_v5 = vpop.f32.mrb[17].mxu0 }
 0x110   :  { %v505_v25 = vadd.f32 %v498_v63, %v219_v11  ;;  %v504_v46 = vadd.f32 %v429_v5, %v148_v0  ;;  %v500_v26 = vpop.f32.mrb[17].mxu1  ;;  %v529_v21 = vpop.permute.xlu0 %528  ;;  %v3780_v11 = vmov 0.0  }
 0x111   :  { %v507_v42 = vmul.f32 0.5, %v503_v51  ;;  %v506_v7 = vadd.f32 %v500_v26, %v221_v13  ;;  %vm530_vm5 = vcmp.eq.s32.totalorder %v529_v21, 1  ;;  %v1036_v13 = vld [vmem:[#allocation3 + $0x28] sm:$0xff] }
 0x112   :  { %v511_v22 = vmul.f32 0.5, %v504_v46  ;;  %v1040_v21 = vld [vmem:[#allocation3 + $0x48] sm:$0xff] }
 0x113   :  { %2846 = vtanh.f32 %v507_v42  ;;  %v516_v30 = vmul.f32 0.5, %v506_v7 }
 0x114   :  { %2848 = vtanh.f32 %v511_v22 }
 0x115   :  { %2850 = vtanh.f32 %v505_v25  ;;  %v1034_v25 = vld [vmem:[#allocation3 + $0x18] sm:$0xff] }
 0x116   :  { %2852 = vtanh.f32 %v516_v30  ;;  %v1038_v30 = vld [vmem:[#allocation3 + $0x38] sm:$0xff] }
 0x11d   :  { %v2847_v10 = vpop.eup %2846 }
 0x11e   :  { %v2849_v14 = vpop.eup %2848  ;;  %v509_v37 = vmul.f32 0.5, %v2847_v10  ;;  %v1031_v10 = vld [vmem:[#allocation3] sm:$0xff] }
 0x11f   :  { %v513_v29 = vmul.f32 0.5, %v2849_v14  ;;  %v2851_v34 = vpop.eup %2850  ;;  %v1035_v14 = vld [vmem:[#allocation3 + $0x20] sm:$0xff] }
 0x120   :  { %v510_v31 = vadd.f32 0.5, %v509_v37  ;;  %v2853_v26 = vpop.eup %2852  ;;  %v3433_v37 = vpack.c.bf16 %v1038_v30, %v1034_v25  ;;  %v1065_v25 = vld [vmem:[#allocation3 + $0x110] sm:$0xff] }
 0x121   :  { %v514_v35 = vadd.f32 0.5, %v513_v29  ;;  %v518_v22 = vmul.f32 0.5, %v2853_v26  ;;  %v3435_v29 = vpack.c.bf16 %v1035_v14, %v1031_v10  ;;  %v1039_v26 = vld [vmem:[#allocation3 + $0x40] sm:$0xff]  ;;  %v1069_v30 = vld [vmem:[#allocation3 + $0x130] sm:$0xff]  ;;  %v1072_v14 = vld [vmem:[#allocation3 + $0x148] sm:$0xff] }
 0x122   :  { %v521_v59 = vmul.f32 %v2851_v34, %v510_v31  ;;  %v1033_v31 = vld [vmem:[#allocation3 + $0x10] sm:$0xff]  ;;  %v3486_v10 = vpack.c.bf16 %v1069_v30, %v1065_v25 }
 0x123   :  { %v520_v63 = vmul.f32 0.0, %v514_v35  ;;  %v519_v51 = vadd.f32 0.5, %v518_v22  ;;  %v1037_v34 = vld [vmem:[#allocation3 + $0x30] sm:$0xff]  ;;  %v1043_v22 = vld [vmem:[#allocation3 + $0x60] sm:$0xff] }
 0x124   :  { %v3438_v35 = vpack.c.bf16 %v1037_v34, %v1033_v31  ;;  %v1076_v31 = vld [vmem:[#allocation3 + $0x168] sm:$0xff]  ;;  %v1074_v34 = vld [vmem:[#allocation3 + $0x158] sm:$0xff]  ;;  %v1089_v25 = vld [vmem:[#allocation3 + $0x1d0] sm:$0xff] }
 0x125   :  { %v522_v0 = vadd.f32 %v521_v59, %v520_v63  ;;  %v1044_v59 = vld [vmem:[#allocation3 + $0x68] sm:$0xff]  ;;  %v1042_v63 = vld [vmem:[#allocation3 + $0x58] sm:$0xff]  ;;  %v1093_v30 = vld [vmem:[#allocation3 + $0x1f0] sm:$0xff] }
 0x127   :  { %2854 = vtanh.f32 %v522_v0  ;;  %v3370_v5 = vsel %vm530_vm5, %v522_v0, 0.0  ;;  %v3443_v0 = vpack.c.bf16 %v1044_v59, %v1040_v21  ;;  %v3491_v21 = vpack.c.bf16 %v1076_v31, %v1072_v14  ;;  %v1078_v59 = vld [vmem:[#allocation3 + $0x178] sm:$0xff] }
 0x128   :  { %v3522_v14 = vpack.c.bf16 %v1093_v30, %v1089_v25 }
 0x131   :  { %v2855_v7 = vpop.eup %2854 }
 0x132   :  { %v524_v46 = vmul.f32 %v2855_v7, %v519_v51  ;;  %v3447_v7 = vpack.c.bf16 %v1043_v22, %v1039_v26  ;;  %v3493_v26 = vpack.c.bf16 %v1078_v59, %v1074_v34 }
 0x134   :  { %v3372_v40 = vsel %vm530_vm5, %v524_v46, 0.0  ;;  %2314 = vmatmul.mubr.msk.f32.vlgmr.msra.gmra.mrb[18].mxu0 %vm530_vm5, %v524_v46  ;;  %2315 = vmatmul.mubr.msk.f32.vlgmr.msra.gmra.mrb[18].mxu1 %vm530_vm5, %v524_v46  ;;  %v1041_v46 = vld [vmem:[#allocation3 + $0x50] sm:$0xff] }
 0x135   :  { %533 = vst [vmem:[#allocation6] sm:$0xff] %v3372_v40  ;;  %2447 = vmatpush1.bf16.msra.mxu0 %v3109_v18  ;;  %2479 = vmatpush1.bf16.msra.mxu1 %v3111_v19  ;;  %v3781_v18 = vmov 0  }
 0x136   :  { %2449 = vmatprep.subr.bf16.mxu0 %v3115_v23  ;;  %2481 = vmatprep.subr.bf16.mxu1 %v3119_v27  ;;  %v1015_v19 = vsel %vm1014_vm6, 1, %v3781_v18  ;;  %v1260_v23 = vsel %vm1259_vm7, 1, %v3781_v18  ;;  %v1750_v27 = vsel %vm1749_vm8, 1, %v3781_v18 }
 0x137   :  { %914 = vmatprep.mubr.f32.mxu0 %v3780_v11  ;;  %985 = vmatprep.mubr.f32.mxu1 %v3780_v11 }
 0x138   :  { %1017 = vperm.xlu1 %2839, %v1015_v19   ;;  %v1048_v19 = vld [vmem:[#allocation3 + $0x88] sm:$0xff] }
 0x139   :  { %2451 = vmatpush1.bf16.msra.mxu0 %v3121_v28  ;;  %2483 = vmatpush1.bf16.msra.mxu1 %v3128_v32  ;;  %v2240_v28 = vsel %vm2239_vm9, 1, %v3781_v18 }
 0x13a   :  { %2453 = vmatprep.subr.bf16.mxu0 %v3135_v36  ;;  %2485 = vmatprep.subr.bf16.mxu1 %v3138_v41 }
 0x13c   :  { %1262 = vperm.xlu1 %2839, %v1260_v23   ;;  %v1052_v23 = vld [vmem:[#allocation3 + $0xa8] sm:$0xff] }
 0x13d   :  { %2455 = vmatpush1.bf16.msra.mxu0 %v3141_v45  ;;  %2487 = vmatpush1.bf16.msra.mxu1 %v3145_v49 }
 0x13e   :  { %2457 = vmatprep.subr.bf16.mxu0 %v3147_v50  ;;  %2489 = vmatprep.subr.bf16.mxu1 %v3150_v54 }
 0x140   :  { %1752 = vperm.xlu1 %2839, %v1750_v27   ;;  %v1050_v27 = vld [vmem:[#allocation3 + $0x98] sm:$0xff] }
 0x141   :  { %2459 = vmatpush1.bf16.msra.mxu0 %v3158_v60  ;;  %2491 = vmatpush1.bf16.msra.mxu1 %v3166_v1 }
 0x142   :  { %2461 = vmatprep.subr.bf16.mxu0 %v3168_v2  ;;  %2493 = vmatprep.subr.bf16.mxu1 %v3172_v6 }
 0x144   :  { %2242 = vperm.xlu1 %2839, %v2240_v28   ;;  %v3455_v28 = vpack.c.bf16 %v1052_v23, %v1048_v19  ;;  %v1080_v23 = vld [vmem:[#allocation3 + $0x188] sm:$0xff] }
 0x145   :  { %2463 = vmatpush1.bf16.msra.mxu0 %v3175_v15  ;;  %2495 = vmatpush1.bf16.msra.mxu1 %v3179_v16 }
 0x146   :  { %2465 = vmatprep.subr.bf16.mxu0 %v3181_v17  ;;  %2497 = vmatprep.subr.bf16.mxu1 %v3184_v24 }
 0x149   :  { %2467 = vmatpush1.bf16.msra.mxu0 %v3189_v33  ;;  %2499 = vmatpush1.bf16.msra.mxu1 %v3200_v38 }
 0x14a   :  { %2469 = vmatprep.subr.bf16.mxu0 %v3202_v39  ;;  %2501 = vmatprep.subr.bf16.mxu1 %v3206_v44 }
 0x14d   :  { %2471 = vmatpush1.bf16.msra.mxu0 %v3215_v55  ;;  %2503 = vmatpush1.bf16.msra.mxu1 %v3220_v57  ;;  %v773_v55 = vpop.permute.xlu0 %772 }
 0x14e   :  { %2473 = vmatprep.subr.bf16.mxu0 %v3222_v58  ;;  %2505 = vmatprep.subr.bf16.mxu1 %v3226_v62  ;;  %vm774_vm10 = vcmp.eq.s32.totalorder %v773_v55, 1  ;;  %v1064_v55 = vld [vmem:[#allocation3 + $0x108] sm:$0xff] }
 0x151   :  { %2475 = vmatpush1.bf16.msra.mxu0 %v3231_v4  ;;  %2507 = vmatpush1.bf16.msra.mxu1 %v3237_v8 }
 0x152   :  { %2541 = vmatprep.subr.bf16.mxu1 %v3433_v37 }
 0x207   :  { %v671_v32 = vpop.f32.mrb[18].mxu0  ;;  %v742_v36 = vpop.f32.mrb[18].mxu1 }
 0x208   :  { %v747_v41 = vadd.f32 %v671_v32, %v3296_v43  ;;  %v749_v45 = vadd.f32 %v742_v36, %v3299_v47  ;;  %v673_v49 = vpop.f32.mrb[19].mxu0  ;;  %v744_v50 = vpop.f32.mrb[19].mxu1  ;;  %v1054_v32 = vld [vmem:[#allocation3 + $0xb8] sm:$0xff]  ;;  %v1047_v36 = vld [vmem:[#allocation3 + $0x80] sm:$0xff] }
 0x209   :  { %v748_v54 = vadd.f32 %v673_v49, %v3301_v52  ;;  %v750_v60 = vadd.f32 %v744_v50, %v3304_v53  ;;  %v1032_v53 = vld [vmem:[#allocation3 + $0x8] sm:$0xff]  ;;  %v1049_v50 = vld [vmem:[#allocation3 + $0x90] sm:$0xff] }
 0x20a   :  { %v751_v1 = vmul.f32 0.5, %v747_v41  ;;  %v3431_v42 = vpack.c.bf16 %v1036_v13, %v1032_v53  ;;  %v1051_v41 = vld [vmem:[#allocation3 + $0xa0] sm:$0xff] }
 0x20b   :  { %v755_v2 = vmul.f32 0.5, %v748_v54  ;;  %v760_v6 = vmul.f32 0.5, %v750_v60  ;;  %v3459_v49 = vpack.c.bf16 %v1051_v41, %v1047_v36  ;;  %v1053_v54 = vld [vmem:[#allocation3 + $0xb0] sm:$0xff]  ;;  %v1086_v41 = vld [vmem:[#allocation3 + $0x1b8] sm:$0xff] }
 0x20c   :  { %2856 = vtanh.f32 %v751_v1  ;;  %2509 = vmatprep.subr.bf16.mxu0 %v3431_v42  ;;  %v3462_v60 = vpack.c.bf16 %v1053_v54, %v1049_v50  ;;  %v1056_v1 = vld [vmem:[#allocation3 + $0xc8] sm:$0xff]  ;;  %v1079_v50 = vld [vmem:[#allocation3 + $0x180] sm:$0xff] }
 0x20d   :  { %2858 = vtanh.f32 %v755_v2  ;;  %v1060_v2 = vld [vmem:[#allocation3 + $0xe8] sm:$0xff]  ;;  %v1083_v54 = vld [vmem:[#allocation3 + $0x1a0] sm:$0xff] }
 0x20e   :  { %2860 = vtanh.f32 %v749_v45  ;;  %v3457_v45 = vpack.c.bf16 %v1054_v32, %v1050_v27  ;;  %v1084_v27 = vld [vmem:[#allocation3 + $0x1a8] sm:$0xff]  ;;  %v1082_v32 = vld [vmem:[#allocation3 + $0x198] sm:$0xff] }
 0x20f   :  { %2862 = vtanh.f32 %v760_v6  ;;  %v1058_v6 = vld [vmem:[#allocation3 + $0xd8] sm:$0xff]  ;;  %v3503_v36 = vpack.c.bf16 %v1084_v27, %v1080_v23 }
 0x216   :  { %v2857_v15 = vpop.eup %2856 }
 0x217   :  { %v2859_v16 = vpop.eup %2858  ;;  %v753_v17 = vmul.f32 0.5, %v2857_v15  ;;  %v3467_v15 = vpack.c.bf16 %v1060_v2, %v1056_v1  ;;  %v3505_v1 = vpack.c.bf16 %v1086_v41, %v1082_v32  ;;  %v3507_v2 = vpack.c.bf16 %v1083_v54, %v1079_v50 }
 0x218   :  { %v757_v24 = vmul.f32 0.5, %v2859_v16  ;;  %v2861_v38 = vpop.eup %2860  ;;  %v1062_v16 = vld [vmem:[#allocation3 + $0xf8] sm:$0xff] }
 0x219   :  { %v754_v33 = vadd.f32 0.5, %v753_v17  ;;  %v2863_v62 = vpop.eup %2862  ;;  %v1055_v17 = vld [vmem:[#allocation3 + $0xc0] sm:$0xff] }
 0x21a   :  { %v758_v39 = vadd.f32 0.5, %v757_v24  ;;  %v762_v4 = vmul.f32 0.5, %v2863_v62  ;;  %v1059_v24 = vld [vmem:[#allocation3 + $0xe0] sm:$0xff]  ;;  %v1066_v62 = vld [vmem:[#allocation3 + $0x118] sm:$0xff] }
 0x21b   :  { %v765_v44 = vmul.f32 %v2861_v38, %v754_v33  ;;  %v3469_v33 = vpack.c.bf16 %v1062_v16, %v1058_v6  ;;  %v3471_v38 = vpack.c.bf16 %v1059_v24, %v1055_v17  ;;  %v1081_v6 = vld [vmem:[#allocation3 + $0x190] sm:$0xff]  ;;  %v1088_v24 = vld [vmem:[#allocation3 + $0x1c8] sm:$0xff] }
 0x21c   :  { %v764_v48 = vmul.f32 %v758_v39, %v3370_v5  ;;  %v763_v8 = vadd.f32 0.5, %v762_v4  ;;  %v1057_v39 = vld [vmem:[#allocation3 + $0xd0] sm:$0xff] }
 0x21d   :  { %v1085_v16 = vld [vmem:[#allocation3 + $0x1b0] sm:$0xff] }
 0x21e   :  { %v766_v57 = vadd.f32 %v765_v44, %v764_v48  ;;  %v1061_v44 = vld [vmem:[#allocation3 + $0xf0] sm:$0xff]  ;;  %v3510_v17 = vpack.c.bf16 %v1085_v16, %v1081_v6 }
 0x21f   :  { %v3474_v48 = vpack.c.bf16 %v1061_v44, %v1057_v39  ;;  %v1092_v39 = vld [vmem:[#allocation3 + $0x1e8] sm:$0xff]  ;;  %v1090_v44 = vld [vmem:[#allocation3 + $0x1d8] sm:$0xff] }
 0x220   :  { %2864 = vtanh.f32 %v766_v57  ;;  %v3421_v58 = vsel %vm774_vm10, %v766_v57, %v3370_v5  ;;  %v1046_v5 = vld [vmem:[#allocation3 + $0x78] sm:$0xff]  ;;  %v1068_v57 = vld [vmem:[#allocation3 + $0x128] sm:$0xff] }
 0x221   :  { %v3445_v51 = vpack.c.bf16 %v1046_v5, %v1042_v63  ;;  %v3479_v4 = vpack.c.bf16 %v1068_v57, %v1064_v55  ;;  %v1071_v63 = vld [vmem:[#allocation3 + $0x140] sm:$0xff]  ;;  %v3515_v55 = vpack.c.bf16 %v1092_v39, %v1088_v24  ;;  %v1094_v57 = vld [vmem:[#allocation3 + $0x1f8] sm:$0xff]  ;;  %v1018_v39 = vpop.permute.xlu1 %1017 }
 0x222   :  { %v1075_v5 = vld [vmem:[#allocation3 + $0x160] sm:$0xff]  ;;  %vm1019_vm11 = vcmp.eq.s32.totalorder %v1018_v39, 1 }
 0x223   :  { %v3495_v22 = vpack.c.bf16 %v1075_v5, %v1071_v63 }
 0x22a   :  { %v2865_v43 = vpop.eup %2864 }
 0x22b   :  { %v768_v47 = vmul.f32 %v2865_v43, %v763_v8  ;;  %v1070_v8 = vld [vmem:[#allocation3 + $0x138] sm:$0xff]  ;;  %v1063_v43 = vld [vmem:[#allocation3 + $0x100] sm:$0xff] }
 0x22c   :  { %v3481_v53 = vpack.c.bf16 %v1070_v8, %v1066_v62  ;;  %v1087_v62 = vld [vmem:[#allocation3 + $0x1c0] sm:$0xff] }
 0x22d   :  { %v3424_v52 = vsel %vm774_vm10, %v768_v47, %v3372_v40  ;;  %v1045_v40 = vld [vmem:[#allocation3 + $0x70] sm:$0xff]  ;;  %v1067_v47 = vld [vmem:[#allocation3 + $0x120] sm:$0xff] }
 0x22e   :  { %778 = vst [vmem:[#allocation6 + $0x8] sm:$0xff] %v3424_v52  ;;  %915 = vmatmul.mubr.f32.vlgmr.msra.gmra.mrb[20].mxu0 %v3424_v52  ;;  %986 = vmatmul.mubr.f32.vlgmr.msra.gmra.mrb[20].mxu1 %v3424_v52  ;;  %v3450_v18 = vpack.c.bf16 %v1045_v40, %v1041_v46  ;;  %v3483_v13 = vpack.c.bf16 %v1067_v47, %v1063_v43  ;;  %v1073_v46 = vld [vmem:[#allocation3 + $0x150] sm:$0xff]  ;;  %v1091_v8 = vld [vmem:[#allocation3 + $0x1e0] sm:$0xff] }
 0x22f   :  { %1159 = vmatprep.mubr.f32.mxu0 %v3780_v11  ;;  %1230 = vmatprep.mubr.f32.mxu1 %v3780_v11  ;;  %v1077_v40 = vld [vmem:[#allocation3 + $0x170] sm:$0xff]  ;;  %v3517_v43 = vpack.c.bf16 %v1094_v57, %v1090_v44  ;;  %v3519_v47 = vpack.c.bf16 %v1091_v8, %v1087_v62 }
 0x230   :  { %2511 = vmatpush1.bf16.msra.mxu0 %v3435_v29  ;;  %2543 = vmatpush1.bf16.msra.mxu1 %v3438_v35  ;;  %v3498_v19 = vpack.c.bf16 %v1077_v40, %v1073_v46 }
 0x231   :  { %2513 = vmatprep.subr.bf16.mxu0 %v3443_v0  ;;  %2545 = vmatprep.subr.bf16.mxu1 %v3445_v51 }
 0x234   :  { %2515 = vmatpush1.bf16.msra.mxu0 %v3447_v7  ;;  %2547 = vmatpush1.bf16.msra.mxu1 %v3450_v18 }
 0x235   :  { %2517 = vmatprep.subr.bf16.mxu0 %v3455_v28  ;;  %2549 = vmatprep.subr.bf16.mxu1 %v3457_v45 }
 0x238   :  { %2519 = vmatpush1.bf16.msra.mxu0 %v3459_v49  ;;  %2551 = vmatpush1.bf16.msra.mxu1 %v3462_v60 }
 0x239   :  { %2521 = vmatprep.subr.bf16.mxu0 %v3467_v15  ;;  %2553 = vmatprep.subr.bf16.mxu1 %v3469_v33 }
 0x23c   :  { %2523 = vmatpush1.bf16.msra.mxu0 %v3471_v38  ;;  %2555 = vmatpush1.bf16.msra.mxu1 %v3474_v48 }
 0x23d   :  { %2525 = vmatprep.subr.bf16.mxu0 %v3479_v4  ;;  %2557 = vmatprep.subr.bf16.mxu1 %v3481_v53 }
 0x240   :  { %2527 = vmatpush1.bf16.msra.mxu0 %v3483_v13  ;;  %2559 = vmatpush1.bf16.msra.mxu1 %v3486_v10 }
 0x241   :  { %2529 = vmatprep.subr.bf16.mxu0 %v3491_v21  ;;  %2561 = vmatprep.subr.bf16.mxu1 %v3493_v26 }
 0x244   :  { %2531 = vmatpush1.bf16.msra.mxu0 %v3495_v22  ;;  %2563 = vmatpush1.bf16.msra.mxu1 %v3498_v19 }
 0x245   :  { %2533 = vmatprep.subr.bf16.mxu0 %v3503_v36  ;;  %2565 = vmatprep.subr.bf16.mxu1 %v3505_v1 }
 0x248   :  { %2535 = vmatpush1.bf16.msra.mxu0 %v3507_v2  ;;  %2567 = vmatpush1.bf16.msra.mxu1 %v3510_v17 }
 0x249   :  { %2537 = vmatprep.subr.bf16.mxu0 %v3515_v55  ;;  %2569 = vmatprep.subr.bf16.mxu1 %v3517_v43 }
 0x24c   :  { %2539 = vmatpush1.bf16.msra.mxu0 %v3519_v47  ;;  %2571 = vmatpush1.bf16.msra.mxu1 %v3522_v14 }
 0x24d   :  { %2573 = vmatprep.subr.bf16.mxu0 %v3431_v42  ;;  %2605 = vmatprep.subr.bf16.mxu1 %v3433_v37 }
 0x301   :  { %v916_v31 = vpop.f32.mrb[20].mxu0  ;;  %v987_v34 = vpop.f32.mrb[20].mxu1 }
 0x302   :  { %v992_v59 = vadd.f32 %v916_v31, %v3306_v61  ;;  %v994_v63 = vadd.f32 %v987_v34, %v3309_v3  ;;  %v918_v5 = vpop.f32.mrb[21].mxu0  ;;  %v989_v46 = vpop.f32.mrb[21].mxu1 }
 0x303   :  { %v993_v40 = vadd.f32 %v918_v5, %v3311_v9  ;;  %v995_v23 = vadd.f32 %v989_v46, %v3314_v12 }
 0x304   :  { %v996_v27 = vmul.f32 0.5, %v992_v59 }
 0x305   :  { %v1000_v32 = vmul.f32 0.5, %v993_v40  ;;  %v1005_v41 = vmul.f32 0.5, %v995_v23  ;;  %v3783_v23 = vld [vmem:[#allocation14_spill] sm:$0xff] }
 0x306   :  { %2866 = vtanh.f32 %v996_v27 }
 0x307   :  { %2868 = vtanh.f32 %v1000_v32  ;;  %v3784_v32 = vld [vmem:[#allocation15_spill] sm:$0xff] }
 0x308   :  { %2870 = vtanh.f32 %v994_v63  ;;  %v3782_v63 = vld [vmem:[#allocation13_spill] sm:$0xff] }
 0x309   :  { %2872 = vtanh.f32 %v1005_v41 }
 0x310   :  { %v2867_v50 = vpop.eup %2866 }
 0x311   :  { %v2869_v54 = vpop.eup %2868  ;;  %v998_v6 = vmul.f32 0.5, %v2867_v50 }
 0x312   :  { %v1002_v16 = vmul.f32 0.5, %v2869_v54  ;;  %v2871_v24 = vpop.eup %2870 }
 0x313   :  { %v999_v61 = vadd.f32 0.5, %v998_v6  ;;  %v2873_v62 = vpop.eup %2872 }
 0x314   :  { %v1003_v3 = vadd.f32 0.5, %v1002_v16  ;;  %v1007_v8 = vmul.f32 0.5, %v2873_v62  ;;  %v1263_v62 = vpop.permute.xlu1 %1262 }
 0x315   :  { %v1010_v44 = vmul.f32 %v2871_v24, %v999_v61  ;;  %vm1264_vm12 = vcmp.eq.s32.totalorder %v1263_v62, 1 }
 0x316   :  { %v1009_v9 = vmul.f32 %v1003_v3, %v3421_v58  ;;  %v1008_v25 = vadd.f32 0.5, %v1007_v8 }
 0x318   :  { %v1011_v12 = vadd.f32 %v1010_v44, %v1009_v9 }
 0x31a   :  { %2874 = vtanh.f32 %v1011_v12  ;;  %v3535_v57 = vsel %vm1019_vm11, %v1011_v12, %v3421_v58 }
 0x324   :  { %v2875_v30 = vpop.eup %2874 }
 0x325   :  { %v1013_v31 = vmul.f32 %v2875_v30, %v1008_v25 }
 0x327   :  { %v3538_v34 = vsel %vm1019_vm11, %v1013_v31, %v3424_v52 }
 0x328   :  { %1023 = vst [vmem:[#allocation6 + $0x10] sm:$0xff] %v3538_v34  ;;  %1160 = vmatmul.mubr.f32.vlgmr.msra.gmra.mrb[22].mxu0 %v3538_v34  ;;  %1231 = vmatmul.mubr.f32.vlgmr.msra.gmra.mrb[22].mxu1 %v3538_v34 }
 0x329   :  { %2575 = vmatpush1.bf16.msra.mxu0 %v3435_v29  ;;  %2607 = vmatpush1.bf16.msra.mxu1 %v3438_v35 }
 0x32a   :  { %2577 = vmatprep.subr.bf16.mxu0 %v3443_v0  ;;  %2609 = vmatprep.subr.bf16.mxu1 %v3445_v51 }
 0x32b   :  { %1404 = vmatprep.mubr.f32.mxu0 %v3780_v11  ;;  %1475 = vmatprep.mubr.f32.mxu1 %v3780_v11 }
 0x32d   :  { %2579 = vmatpush1.bf16.msra.mxu0 %v3447_v7  ;;  %2611 = vmatpush1.bf16.msra.mxu1 %v3450_v18 }
 0x32e   :  { %2581 = vmatprep.subr.bf16.mxu0 %v3455_v28  ;;  %2613 = vmatprep.subr.bf16.mxu1 %v3457_v45 }
 0x331   :  { %2583 = vmatpush1.bf16.msra.mxu0 %v3459_v49  ;;  %2615 = vmatpush1.bf16.msra.mxu1 %v3462_v60 }
 0x332   :  { %2585 = vmatprep.subr.bf16.mxu0 %v3467_v15  ;;  %2617 = vmatprep.subr.bf16.mxu1 %v3469_v33 }
 0x335   :  { %2587 = vmatpush1.bf16.msra.mxu0 %v3471_v38  ;;  %2619 = vmatpush1.bf16.msra.mxu1 %v3474_v48 }
 0x336   :  { %2589 = vmatprep.subr.bf16.mxu0 %v3479_v4  ;;  %2621 = vmatprep.subr.bf16.mxu1 %v3481_v53 }
 0x339   :  { %2591 = vmatpush1.bf16.msra.mxu0 %v3483_v13  ;;  %2623 = vmatpush1.bf16.msra.mxu1 %v3486_v10 }
 0x33a   :  { %2593 = vmatprep.subr.bf16.mxu0 %v3491_v21  ;;  %2625 = vmatprep.subr.bf16.mxu1 %v3493_v26 }
 0x33d   :  { %2595 = vmatpush1.bf16.msra.mxu0 %v3495_v22  ;;  %2627 = vmatpush1.bf16.msra.mxu1 %v3498_v19 }
 0x33e   :  { %2597 = vmatprep.subr.bf16.mxu0 %v3503_v36  ;;  %2629 = vmatprep.subr.bf16.mxu1 %v3505_v1 }
 0x341   :  { %2599 = vmatpush1.bf16.msra.mxu0 %v3507_v2  ;;  %2631 = vmatpush1.bf16.msra.mxu1 %v3510_v17 }
 0x342   :  { %2601 = vmatprep.subr.bf16.mxu0 %v3515_v55  ;;  %2633 = vmatprep.subr.bf16.mxu1 %v3517_v43 }
 0x345   :  { %2603 = vmatpush1.bf16.msra.mxu0 %v3519_v47  ;;  %2635 = vmatpush1.bf16.msra.mxu1 %v3522_v14 }
 0x346   :  { %2637 = vmatprep.subr.bf16.mxu0 %v3431_v42  ;;  %2669 = vmatprep.subr.bf16.mxu1 %v3433_v37 }
 0x3fb   :  { %v1161_v58 = vpop.f32.mrb[22].mxu0  ;;  %v1232_v52 = vpop.f32.mrb[22].mxu1 }
 0x3fc   :  { %v1237_v59 = vadd.f32 %v1161_v58, %v3316_v20  ;;  %v1239_v5 = vadd.f32 %v1232_v52, %v3782_v63  ;;  %v1163_v46 = vpop.f32.mrb[23].mxu0  ;;  %v1234_v40 = vpop.f32.mrb[23].mxu1 }
 0x3fd   :  { %v1238_v27 = vadd.f32 %v1163_v46, %v3783_v23  ;;  %v1240_v41 = vadd.f32 %v1234_v40, %v3784_v32  ;;  %v3786_v40 = vld [vmem:[#allocation17_spill] sm:$0xff] }
 0x3fe   :  { %v1241_v50 = vmul.f32 0.5, %v1237_v59 }
 0x3ff   :  { %v1245_v54 = vmul.f32 0.5, %v1238_v27  ;;  %v1250_v6 = vmul.f32 0.5, %v1240_v41  ;;  %v3787_v41 = vld [vmem:[#allocation18_spill] sm:$0xff] }
 0x400   :  { %2876 = vtanh.f32 %v1241_v50 }
 0x401   :  { %2878 = vtanh.f32 %v1245_v54  ;;  %v3788_v54 = vld [vmem:[#allocation19_spill] sm:$0xff] }
 0x402   :  { %2880 = vtanh.f32 %v1239_v5  ;;  %v3785_v5 = vld [vmem:[#allocation16_spill] sm:$0xff] }
 0x403   :  { %2882 = vtanh.f32 %v1250_v6 }
 0x40a   :  { %v2877_v16 = vpop.eup %2876 }
 0x40b   :  { %v2879_v61 = vpop.eup %2878  ;;  %v1243_v24 = vmul.f32 0.5, %v2877_v16 }
 0x40c   :  { %v1247_v3 = vmul.f32 0.5, %v2879_v61  ;;  %v2881_v39 = vpop.eup %2880 }
 0x40d   :  { %v1244_v20 = vadd.f32 0.5, %v1243_v24  ;;  %v2883_v30 = vpop.eup %2882 }
 0x40e   :  { %v1248_v44 = vadd.f32 0.5, %v1247_v3  ;;  %v1252_v31 = vmul.f32 0.5, %v2883_v30 }
 0x40f   :  { %v1255_v9 = vmul.f32 %v2881_v39, %v1244_v20 }
 0x410   :  { %v1254_v12 = vmul.f32 %v1248_v44, %v3535_v57  ;;  %v1253_v58 = vadd.f32 0.5, %v1252_v31 }
 0x412   :  { %v1256_v8 = vadd.f32 %v1255_v9, %v1254_v12 }
 0x414   :  { %2884 = vtanh.f32 %v1256_v8  ;;  %v3583_v25 = vsel %vm1264_vm12, %v1256_v8, %v3535_v57  ;;  %v1508_v8 = vpop.permute.xlu0 %1507 }
 0x415   :  { %vm1509_vm13 = vcmp.eq.s32.totalorder %v1508_v8, 1  ;;  %v2021_v8 = vld [vmem:[#allocation3 + $0x50] sm:$0xff] }
 0x41e   :  { %v2885_v52 = vpop.eup %2884 }
 0x41f   :  { %v1258_v59 = vmul.f32 %v2885_v52, %v1253_v58 }
 0x421   :  { %v3586_v63 = vsel %vm1264_vm12, %v1258_v59, %v3538_v34 }
 0x422   :  { %1268 = vst [vmem:[#allocation6 + $0x18] sm:$0xff] %v3586_v63  ;;  %1405 = vmatmul.mubr.f32.vlgmr.msra.gmra.mrb[24].mxu0 %v3586_v63  ;;  %1476 = vmatmul.mubr.f32.vlgmr.msra.gmra.mrb[24].mxu1 %v3586_v63 }
 0x423   :  { %2639 = vmatpush1.bf16.msra.mxu0 %v3435_v29  ;;  %2671 = vmatpush1.bf16.msra.mxu1 %v3438_v35 }
 0x424   :  { %2641 = vmatprep.subr.bf16.mxu0 %v3443_v0  ;;  %2673 = vmatprep.subr.bf16.mxu1 %v3445_v51 }
 0x425   :  { %1649 = vmatprep.mubr.f32.mxu0 %v3780_v11  ;;  %1720 = vmatprep.mubr.f32.mxu1 %v3780_v11 }
 0x427   :  { %2643 = vmatpush1.bf16.msra.mxu0 %v3447_v7  ;;  %2675 = vmatpush1.bf16.msra.mxu1 %v3450_v18 }
 0x428   :  { %2645 = vmatprep.subr.bf16.mxu0 %v3455_v28  ;;  %2677 = vmatprep.subr.bf16.mxu1 %v3457_v45 }
 0x42b   :  { %2647 = vmatpush1.bf16.msra.mxu0 %v3459_v49  ;;  %2679 = vmatpush1.bf16.msra.mxu1 %v3462_v60 }
 0x42c   :  { %2649 = vmatprep.subr.bf16.mxu0 %v3467_v15  ;;  %2681 = vmatprep.subr.bf16.mxu1 %v3469_v33 }
 0x42f   :  { %2651 = vmatpush1.bf16.msra.mxu0 %v3471_v38  ;;  %2683 = vmatpush1.bf16.msra.mxu1 %v3474_v48 }
 0x430   :  { %2653 = vmatprep.subr.bf16.mxu0 %v3479_v4  ;;  %2685 = vmatprep.subr.bf16.mxu1 %v3481_v53 }
 0x433   :  { %2655 = vmatpush1.bf16.msra.mxu0 %v3483_v13  ;;  %2687 = vmatpush1.bf16.msra.mxu1 %v3486_v10 }
 0x434   :  { %2657 = vmatprep.subr.bf16.mxu0 %v3491_v21  ;;  %2689 = vmatprep.subr.bf16.mxu1 %v3493_v26 }
 0x437   :  { %2659 = vmatpush1.bf16.msra.mxu0 %v3495_v22  ;;  %2691 = vmatpush1.bf16.msra.mxu1 %v3498_v19 }
 0x438   :  { %2661 = vmatprep.subr.bf16.mxu0 %v3503_v36  ;;  %2693 = vmatprep.subr.bf16.mxu1 %v3505_v1 }
 0x43b   :  { %2663 = vmatpush1.bf16.msra.mxu0 %v3507_v2  ;;  %2695 = vmatpush1.bf16.msra.mxu1 %v3510_v17 }
 0x43c   :  { %2665 = vmatprep.subr.bf16.mxu0 %v3515_v55  ;;  %2697 = vmatprep.subr.bf16.mxu1 %v3517_v43 }
 0x43f   :  { %2667 = vmatpush1.bf16.msra.mxu0 %v3519_v47  ;;  %2699 = vmatpush1.bf16.msra.mxu1 %v3522_v14 }
 0x440   :  { %2701 = vmatprep.subr.bf16.mxu0 %v3431_v42  ;;  %2733 = vmatprep.subr.bf16.mxu1 %v3433_v37 }
 0x4f5   :  { %v1406_v57 = vpop.f32.mrb[24].mxu0  ;;  %v1477_v34 = vpop.f32.mrb[24].mxu1 }
 0x4f6   :  { %v1482_v46 = vadd.f32 %v1406_v57, %v3785_v5  ;;  %v1484_v23 = vadd.f32 %v1477_v34, %v3786_v40  ;;  %v1408_v27 = vpop.f32.mrb[25].mxu0  ;;  %v1479_v32 = vpop.f32.mrb[25].mxu1  ;;  %v2012_v40 = vld [vmem:[#allocation3 + $0x8] sm:$0xff] }
 0x4f7   :  { %v1483_v50 = vadd.f32 %v1408_v27, %v3787_v41  ;;  %v1485_v6 = vadd.f32 %v1479_v32, %v3788_v54  ;;  %v2014_v27 = vld [vmem:[#allocation3 + $0x18] sm:$0xff]  ;;  %v2015_v54 = vld [vmem:[#allocation3 + $0x20] sm:$0xff] }
 0x4f8   :  { %v1486_v16 = vmul.f32 0.5, %v1482_v46  ;;  %v2018_v41 = vld [vmem:[#allocation3 + $0x38] sm:$0xff] }
 0x4f9   :  { %v1490_v61 = vmul.f32 0.5, %v1483_v50  ;;  %v1495_v42 = vmul.f32 0.5, %v1485_v6  ;;  %v2011_v50 = vld [vmem:[#allocation3] sm:$0xff]  ;;  %v2796_v6 = vpack.c.bf16 %v2018_v41, %v2014_v27 }
 0x4fa   :  { %2886 = vtanh.f32 %v1486_v16  ;;  %v2766_v16 = vpack.c.bf16 %v2015_v54, %v2011_v50  ;;  %v2051_v41 = vld [vmem:[#allocation3 + $0x140] sm:$0xff] }
 0x4fb   :  { %2888 = vtanh.f32 %v1490_v61  ;;  %v2013_v61 = vld [vmem:[#allocation3 + $0x10] sm:$0xff]  ;;  %v2055_v50 = vld [vmem:[#allocation3 + $0x160] sm:$0xff] }
 0x4fc   :  { %2890 = vtanh.f32 %v1484_v23  ;;  %v2016_v23 = vld [vmem:[#allocation3 + $0x28] sm:$0xff] }
 0x4fd   :  { %2892 = vtanh.f32 %v1495_v42  ;;  %v2764_v32 = vpack.c.bf16 %v2016_v23, %v2012_v40  ;;  %v2017_v42 = vld [vmem:[#allocation3 + $0x30] sm:$0xff]  ;;  %v2056_v40 = vld [vmem:[#allocation3 + $0x168] sm:$0xff]  ;;  %v2054_v23 = vld [vmem:[#allocation3 + $0x158] sm:$0xff] }
 0x504   :  { %v2887_v24 = vpop.eup %2886 }
 0x505   :  { %v2889_v37 = vpop.eup %2888  ;;  %v1488_v3 = vmul.f32 0.5, %v2887_v24  ;;  %v2798_v24 = vpack.c.bf16 %v2017_v42, %v2013_v61  ;;  %v2057_v61 = vld [vmem:[#allocation3 + $0x170] sm:$0xff] }
 0x506   :  { %v1492_v20 = vmul.f32 0.5, %v2889_v37  ;;  %v2891_v44 = vpop.eup %2890  ;;  %v2020_v37 = vld [vmem:[#allocation3 + $0x48] sm:$0xff] }
 0x507   :  { %v1489_v39 = vadd.f32 0.5, %v1488_v3  ;;  %v2893_v58 = vpop.eup %2892  ;;  %v2024_v3 = vld [vmem:[#allocation3 + $0x68] sm:$0xff] }
 0x508   :  { %v1493_v9 = vadd.f32 0.5, %v1492_v20  ;;  %v1497_v52 = vmul.f32 0.5, %v2893_v58  ;;  %v2022_v20 = vld [vmem:[#allocation3 + $0x58] sm:$0xff]  ;;  %v2028_v58 = vld [vmem:[#allocation3 + $0x88] sm:$0xff] }
 0x509   :  { %v1500_v12 = vmul.f32 %v2891_v44, %v1489_v39  ;;  %v2026_v39 = vld [vmem:[#allocation3 + $0x78] sm:$0xff]  ;;  %v2019_v44 = vld [vmem:[#allocation3 + $0x40] sm:$0xff] }
 0x50a   :  { %v1499_v62 = vmul.f32 %v1493_v9, %v3583_v25  ;;  %v1498_v59 = vadd.f32 0.5, %v1497_v52  ;;  %v2023_v9 = vld [vmem:[#allocation3 + $0x60] sm:$0xff]  ;;  %v2032_v52 = vld [vmem:[#allocation3 + $0xa8] sm:$0xff] }
 0x50c   :  { %v1501_v30 = vadd.f32 %v1500_v12, %v1499_v62  ;;  %v2800_v12 = vpack.c.bf16 %v2026_v39, %v2022_v20  ;;  %v2770_v62 = vpack.c.bf16 %v2023_v9, %v2019_v44  ;;  %v2059_v39 = vld [vmem:[#allocation3 + $0x180] sm:$0xff] }
 0x50d   :  { %v2063_v44 = vld [vmem:[#allocation3 + $0x1a0] sm:$0xff] }
 0x50e   :  { %2894 = vtanh.f32 %v1501_v30  ;;  %v3631_v31 = vsel %vm1509_vm13, %v1501_v30, %v3583_v25  ;;  %v2025_v30 = vld [vmem:[#allocation3 + $0x70] sm:$0xff] }
 0x518   :  { %v2895_v57 = vpop.eup %2894 }
 0x519   :  { %v1503_v34 = vmul.f32 %v2895_v57, %v1498_v59  ;;  %v2030_v59 = vld [vmem:[#allocation3 + $0x98] sm:$0xff]  ;;  %v2772_v57 = vpack.c.bf16 %v2032_v52, %v2028_v58  ;;  %v2072_v58 = vld [vmem:[#allocation3 + $0x1e8] sm:$0xff] }
 0x51a   :  { %v2070_v52 = vld [vmem:[#allocation3 + $0x1d8] sm:$0xff] }
 0x51b   :  { %v3634_v5 = vsel %vm1509_vm13, %v1503_v34, %v3586_v63  ;;  %v2034_v34 = vld [vmem:[#allocation3 + $0xb8] sm:$0xff] }
 0x51c   :  { %1513 = vst [vmem:[#allocation6 + $0x20] sm:$0xff] %v3634_v5  ;;  %1650 = vmatmul.mubr.f32.vlgmr.msra.gmra.mrb[26].mxu0 %v3634_v5  ;;  %1721 = vmatmul.mubr.f32.vlgmr.msra.gmra.mrb[26].mxu1 %v3634_v5 }
 0x51d   :  { %2703 = vmatpush1.bf16.msra.mxu0 %v3435_v29  ;;  %2735 = vmatpush1.bf16.msra.mxu1 %v3438_v35 }
 0x51e   :  { %2705 = vmatprep.subr.bf16.mxu0 %v3443_v0  ;;  %2737 = vmatprep.subr.bf16.mxu1 %v3445_v51  ;;  %v3789_v0 = vld [vmem:[#allocation20_spill] sm:$0xff] }
 0x51f   :  { %1894 = vmatprep.mubr.f32.mxu0 %v3780_v11  ;;  %1965 = vmatprep.mubr.f32.mxu1 %v3780_v11 }
 0x521   :  { %2707 = vmatpush1.bf16.msra.mxu0 %v3447_v7  ;;  %2739 = vmatpush1.bf16.msra.mxu1 %v3450_v18  ;;  %v3790_v7 = vld [vmem:[#allocation21_spill] sm:$0xff] }
 0x522   :  { %2709 = vmatprep.subr.bf16.mxu0 %v3455_v28  ;;  %2741 = vmatprep.subr.bf16.mxu1 %v3457_v45 }
 0x525   :  { %2711 = vmatpush1.bf16.msra.mxu0 %v3459_v49  ;;  %2743 = vmatpush1.bf16.msra.mxu1 %v3462_v60  ;;  %v3791_v49 = vld [vmem:[#allocation22_spill] sm:$0xff] }
 0x526   :  { %2713 = vmatprep.subr.bf16.mxu0 %v3467_v15  ;;  %2745 = vmatprep.subr.bf16.mxu1 %v3469_v33  ;;  %v3792_v15 = vld [vmem:[#allocation23_spill] sm:$0xff] }
 0x529   :  { %2715 = vmatpush1.bf16.msra.mxu0 %v3471_v38  ;;  %2747 = vmatpush1.bf16.msra.mxu1 %v3474_v48 }
 0x52a   :  { %2717 = vmatprep.subr.bf16.mxu0 %v3479_v4  ;;  %2749 = vmatprep.subr.bf16.mxu1 %v3481_v53 }
 0x52d   :  { %2719 = vmatpush1.bf16.msra.mxu0 %v3483_v13  ;;  %2751 = vmatpush1.bf16.msra.mxu1 %v3486_v10 }
 0x52e   :  { %2721 = vmatprep.subr.bf16.mxu0 %v3491_v21  ;;  %2753 = vmatprep.subr.bf16.mxu1 %v3493_v26 }
 0x531   :  { %2723 = vmatpush1.bf16.msra.mxu0 %v3495_v22  ;;  %2755 = vmatpush1.bf16.msra.mxu1 %v3498_v19 }
 0x532   :  { %2725 = vmatprep.subr.bf16.mxu0 %v3503_v36  ;;  %2757 = vmatprep.subr.bf16.mxu1 %v3505_v1 }
 0x535   :  { %2727 = vmatpush1.bf16.msra.mxu0 %v3507_v2  ;;  %2759 = vmatpush1.bf16.msra.mxu1 %v3510_v17  ;;  %v1753_v2 = vpop.permute.xlu1 %1752 }
 0x536   :  { %2729 = vmatprep.subr.bf16.mxu0 %v3515_v55  ;;  %2761 = vmatprep.subr.bf16.mxu1 %v3517_v43  ;;  %vm1754_vm14 = vcmp.eq.s32.totalorder %v1753_v2, 1  ;;  %v2047_v2 = vld [vmem:[#allocation3 + $0x120] sm:$0xff] }
 0x539   :  { %2731 = vmatpush1.bf16.msra.mxu0 %v3519_v47  ;;  %2763 = vmatpush1.bf16.msra.mxu1 %v3522_v14 }
 0x53a   :  { %2765 = vmatprep.subr.bf16.mxu0 %v2764_v32  ;;  %2797 = vmatprep.subr.bf16.mxu1 %v2796_v6  ;;  %v2058_v32 = vld [vmem:[#allocation3 + $0x178] sm:$0xff]  ;;  %v2786_v6 = vpack.c.bf16 %v2055_v50, %v2051_v41 }
 0x53b   :  { %v2816_v54 = vpack.c.bf16 %v2058_v32, %v2054_v23 }
 0x5ef   :  { %v1651_v29 = vpop.f32.mrb[26].mxu0  ;;  %v1722_v35 = vpop.f32.mrb[26].mxu1 }
 0x5f0   :  { %v1727_v51 = vadd.f32 %v1651_v29, %v3789_v0  ;;  %v1729_v18 = vadd.f32 %v1722_v35, %v3790_v7  ;;  %v1653_v28 = vpop.f32.mrb[27].mxu0  ;;  %v1724_v45 = vpop.f32.mrb[27].mxu1  ;;  %v2031_v29 = vld [vmem:[#allocation3 + $0xa0] sm:$0xff]  ;;  %v2804_v35 = vpack.c.bf16 %v2034_v34, %v2030_v59  ;;  %v2033_v7 = vld [vmem:[#allocation3 + $0xb0] sm:$0xff] }
 0x5f1   :  { %v1728_v60 = vadd.f32 %v1653_v28, %v3791_v49  ;;  %v1730_v33 = vadd.f32 %v1724_v45, %v3792_v15  ;;  %v2036_v28 = vld [vmem:[#allocation3 + $0xc8] sm:$0xff]  ;;  %v2038_v49 = vld [vmem:[#allocation3 + $0xd8] sm:$0xff]  ;;  %v2067_v34 = vld [vmem:[#allocation3 + $0x1c0] sm:$0xff] }
 0x5f2   :  { %v1731_v38 = vmul.f32 0.5, %v1727_v51  ;;  %v2029_v51 = vld [vmem:[#allocation3 + $0x90] sm:$0xff]  ;;  %v2040_v45 = vld [vmem:[#allocation3 + $0xe8] sm:$0xff]  ;;  %v2042_v15 = vld [vmem:[#allocation3 + $0xf8] sm:$0xff] }
 0x5f3   :  { %v1735_v48 = vmul.f32 0.5, %v1728_v60  ;;  %v1740_v4 = vmul.f32 0.5, %v1730_v33  ;;  %v2776_v60 = vpack.c.bf16 %v2040_v45, %v2036_v28  ;;  %v2035_v33 = vld [vmem:[#allocation3 + $0xc0] sm:$0xff]  ;;  %v3793_v45 = vld [vmem:[#allocation24_spill] sm:$0xff] }
 0x5f4   :  { %2896 = vtanh.f32 %v1731_v38  ;;  %v2039_v38 = vld [vmem:[#allocation3 + $0xe0] sm:$0xff] }
 0x5f5   :  { %2898 = vtanh.f32 %v1735_v48  ;;  %v2808_v48 = vpack.c.bf16 %v2042_v15, %v2038_v49 }
 0x5f6   :  { %2900 = vtanh.f32 %v1729_v18  ;;  %v2806_v18 = vpack.c.bf16 %v2033_v7, %v2029_v51  ;;  %v2073_v51 = vld [vmem:[#allocation3 + $0x1f0] sm:$0xff] }
 0x5f7   :  { %2902 = vtanh.f32 %v1740_v4  ;;  %v2778_v4 = vpack.c.bf16 %v2039_v38, %v2035_v33 }
 0x5fe   :  { %v2897_v53 = vpop.eup %2896 }
 0x5ff   :  { %v2899_v13 = vpop.eup %2898  ;;  %v1733_v10 = vmul.f32 0.5, %v2897_v53  ;;  %v2037_v53 = vld [vmem:[#allocation3 + $0xd0] sm:$0xff] }
 0x600   :  { %v1737_v21 = vmul.f32 0.5, %v2899_v13  ;;  %v2901_v22 = vpop.eup %2900  ;;  %v2041_v13 = vld [vmem:[#allocation3 + $0xf0] sm:$0xff] }
 0x601   :  { %v1734_v26 = vadd.f32 0.5, %v1733_v10  ;;  %v2903_v43 = vpop.eup %2902  ;;  %v2810_v10 = vpack.c.bf16 %v2041_v13, %v2037_v53  ;;  %v3796_v53 = vld [vmem:[#allocation27_spill] sm:$0xff] }
 0x602   :  { %v1738_v19 = vadd.f32 0.5, %v1737_v21  ;;  %v1742_v47 = vmul.f32 0.5, %v2903_v43  ;;  %v2044_v21 = vld [vmem:[#allocation3 + $0x108] sm:$0xff] }
 0x603   :  { %v1745_v36 = vmul.f32 %v2901_v22, %v1734_v26  ;;  %v2048_v26 = vld [vmem:[#allocation3 + $0x128] sm:$0xff]  ;;  %v2046_v22 = vld [vmem:[#allocation3 + $0x118] sm:$0xff] }
 0x604   :  { %v1744_v1 = vmul.f32 %v1738_v19, %v3631_v31  ;;  %v1743_v14 = vadd.f32 0.5, %v1742_v47  ;;  %v2780_v19 = vpack.c.bf16 %v2048_v26, %v2044_v21  ;;  %v2045_v47 = vld [vmem:[#allocation3 + $0x110] sm:$0xff] }
 0x606   :  { %v1746_v17 = vadd.f32 %v1745_v36, %v1744_v1  ;;  %v2050_v36 = vld [vmem:[#allocation3 + $0x138] sm:$0xff]  ;;  %v2043_v1 = vld [vmem:[#allocation3 + $0x100] sm:$0xff] }
 0x607   :  { %v2782_v43 = vpack.c.bf16 %v2047_v2, %v2043_v1 }
 0x608   :  { %2904 = vtanh.f32 %v1746_v17  ;;  %v3677_v55 = vsel %vm1754_vm14, %v1746_v17, %v3631_v31  ;;  %v2802_v31 = vpack.c.bf16 %v2025_v30, %v2021_v8  ;;  %v2812_v17 = vpack.c.bf16 %v2050_v36, %v2046_v22  ;;  %v2065_v8 = vld [vmem:[#allocation3 + $0x1b0] sm:$0xff] }
 0x612   :  { %v2905_v25 = vpop.eup %2904 }
 0x613   :  { %v1748_v63 = vmul.f32 %v2905_v25, %v1743_v14  ;;  %v2049_v14 = vld [vmem:[#allocation3 + $0x130] sm:$0xff] }
 0x614   :  { %v2814_v25 = vpack.c.bf16 %v2049_v14, %v2045_v47  ;;  %v1998_v14 = vpop.permute.xlu0 %1997 }
 0x615   :  { %v3680_v46 = vsel %vm1754_vm14, %v1748_v63, %v3634_v5  ;;  %v2027_v5 = vld [vmem:[#allocation3 + $0x80] sm:$0xff]  ;;  %v2052_v63 = vld [vmem:[#allocation3 + $0x148] sm:$0xff]  ;;  %vm1999_vm15 = vcmp.eq.s32.totalorder %v1998_v14, 1 }
 0x616   :  { %1758 = vst [vmem:[#allocation6 + $0x28] sm:$0xff] %v3680_v46  ;;  %1895 = vmatmul.mubr.f32.vlgmr.msra.gmra.mrb[28].mxu0 %v3680_v46  ;;  %1966 = vmatmul.mubr.f32.vlgmr.msra.gmra.mrb[28].mxu1 %v3680_v46  ;;  %v2774_v0 = vpack.c.bf16 %v2031_v29, %v2027_v5  ;;  %v2784_v27 = vpack.c.bf16 %v2056_v40, %v2052_v63  ;;  %v2071_v5 = vld [vmem:[#allocation3 + $0x1e0] sm:$0xff] }
 0x617   :  { %2139 = vmatprep.mubr.f32.mxu0 %v3780_v11  ;;  %2210 = vmatprep.mubr.f32.mxu1 %v3780_v11  ;;  %v2768_v11 = vpack.c.bf16 %v2024_v3, %v2020_v37  ;;  %v2064_v37 = vld [vmem:[#allocation3 + $0x1a8] sm:$0xff]  ;;  %v2062_v3 = vld [vmem:[#allocation3 + $0x198] sm:$0xff] }
 0x618   :  { %2767 = vmatpush1.bf16.msra.mxu0 %v2766_v16  ;;  %2799 = vmatpush1.bf16.msra.mxu1 %v2798_v24  ;;  %v2053_v16 = vld [vmem:[#allocation3 + $0x150] sm:$0xff]  ;;  %v2060_v24 = vld [vmem:[#allocation3 + $0x188] sm:$0xff] }
 0x619   :  { %2769 = vmatprep.subr.bf16.mxu0 %v2768_v11  ;;  %2801 = vmatprep.subr.bf16.mxu1 %v2800_v12  ;;  %v2818_v42 = vpack.c.bf16 %v2057_v61, %v2053_v16  ;;  %v2788_v20 = vpack.c.bf16 %v2064_v37, %v2060_v24  ;;  %v2066_v11 = vld [vmem:[#allocation3 + $0x1b8] sm:$0xff]  ;;  %v2790_v12 = vpack.c.bf16 %v2063_v44, %v2059_v39  ;;  %v3797_v61 = vld [vmem:[#allocation28_spill] sm:$0xff]  ;;  %v3798_v24 = vld [vmem:[#allocation29_spill] sm:$0xff] }
 0x61a   :  { %v2820_v9 = vpack.c.bf16 %v2066_v11, %v2062_v3  ;;  %v3799_v11 = vld [vmem:[#allocation30_spill] sm:$0xff] }
 0x61c   :  { %2771 = vmatpush1.bf16.msra.mxu0 %v2770_v62  ;;  %2803 = vmatpush1.bf16.msra.mxu1 %v2802_v31  ;;  %v2061_v62 = vld [vmem:[#allocation3 + $0x190] sm:$0xff]  ;;  %v2068_v31 = vld [vmem:[#allocation3 + $0x1c8] sm:$0xff] }
 0x61d   :  { %2773 = vmatprep.subr.bf16.mxu0 %v2772_v57  ;;  %2805 = vmatprep.subr.bf16.mxu1 %v2804_v35  ;;  %v2822_v30 = vpack.c.bf16 %v2065_v8, %v2061_v62  ;;  %v2792_v59 = vpack.c.bf16 %v2072_v58, %v2068_v31  ;;  %v2074_v57 = vld [vmem:[#allocation3 + $0x1f8] sm:$0xff]  ;;  %v2794_v35 = vpack.c.bf16 %v2071_v5, %v2067_v34 }
 0x61e   :  { %v2824_v29 = vpack.c.bf16 %v2074_v57, %v2070_v52  ;;  %v2243_v57 = vpop.permute.xlu1 %2242 }
 0x61f   :  { %vm2244_vm0 = vcmp.eq.s32.totalorder %v2243_v57, 1 }
 0x620   :  { %2775 = vmatpush1.bf16.msra.mxu0 %v2774_v0  ;;  %2807 = vmatpush1.bf16.msra.mxu1 %v2806_v18  ;;  %v2069_v0 = vld [vmem:[#allocation3 + $0x1d0] sm:$0xff] }
 0x621   :  { %2777 = vmatprep.subr.bf16.mxu0 %v2776_v60  ;;  %2809 = vmatprep.subr.bf16.mxu1 %v2808_v48  ;;  %v2826_v7 = vpack.c.bf16 %v2073_v51, %v2069_v0  ;;  %v3794_v60 = vld [vmem:[#allocation25_spill] sm:$0xff]  ;;  %v3795_v48 = vld [vmem:[#allocation26_spill] sm:$0xff] }
 0x624   :  { %2779 = vmatpush1.bf16.msra.mxu0 %v2778_v4  ;;  %2811 = vmatpush1.bf16.msra.mxu1 %v2810_v10 }
 0x625   :  { %2781 = vmatprep.subr.bf16.mxu0 %v2780_v19  ;;  %2813 = vmatprep.subr.bf16.mxu1 %v2812_v17 }
 0x628   :  { %2783 = vmatpush1.bf16.msra.mxu0 %v2782_v43  ;;  %2815 = vmatpush1.bf16.msra.mxu1 %v2814_v25 }
 0x629   :  { %2785 = vmatprep.subr.bf16.mxu0 %v2784_v27  ;;  %2817 = vmatprep.subr.bf16.mxu1 %v2816_v54 }
 0x62c   :  { %2787 = vmatpush1.bf16.msra.mxu0 %v2786_v6  ;;  %2819 = vmatpush1.bf16.msra.mxu1 %v2818_v42 }
 0x62d   :  { %2789 = vmatprep.subr.bf16.mxu0 %v2788_v20  ;;  %2821 = vmatprep.subr.bf16.mxu1 %v2820_v9 }
 0x630   :  { %2791 = vmatpush1.bf16.msra.mxu0 %v2790_v12  ;;  %2823 = vmatpush1.bf16.msra.mxu1 %v2822_v30 }
 0x631   :  { %2793 = vmatprep.subr.bf16.mxu0 %v2792_v59  ;;  %2825 = vmatprep.subr.bf16.mxu1 %v2824_v29 }
 0x634   :  { %2795 = vmatpush1.bf16.msra.mxu0 %v2794_v35  ;;  %2827 = vmatpush1.bf16.msra.mxu1 %v2826_v7 }
 0x6e9   :  { %v1896_v18 = vpop.f32.mrb[28].mxu0  ;;  %v1967_v28 = vpop.f32.mrb[28].mxu1 }
 0x6ea   :  { %v1972_v49 = vadd.f32 %v1896_v18, %v3793_v45  ;;  %v1974_v15 = vadd.f32 %v1967_v28, %v3794_v60  ;;  %v1898_v33 = vpop.f32.mrb[29].mxu0  ;;  %v1969_v38 = vpop.f32.mrb[29].mxu1 }
 0x6eb   :  { %v1973_v4 = vadd.f32 %v1898_v33, %v3795_v48  ;;  %v1975_v13 = vadd.f32 %v1969_v38, %v3796_v53 }
 0x6ec   :  { %v1976_v10 = vmul.f32 0.5, %v1972_v49 }
 0x6ed   :  { %v1980_v21 = vmul.f32 0.5, %v1973_v4  ;;  %v1985_v26 = vmul.f32 0.5, %v1975_v13 }
 0x6ee   :  { %2906 = vtanh.f32 %v1976_v10 }
 0x6ef   :  { %2908 = vtanh.f32 %v1980_v21 }
 0x6f0   :  { %2910 = vtanh.f32 %v1974_v15 }
 0x6f1   :  { %2912 = vtanh.f32 %v1985_v26 }
 0x6f8   :  { %v2907_v22 = vpop.eup %2906 }
 0x6f9   :  { %v2909_v19 = vpop.eup %2908  ;;  %v1978_v36 = vmul.f32 0.5, %v2907_v22 }
 0x6fa   :  { %v1982_v1 = vmul.f32 0.5, %v2909_v19  ;;  %v2911_v17 = vpop.eup %2910 }
 0x6fb   :  { %v1979_v2 = vadd.f32 0.5, %v1978_v36  ;;  %v2913_v23 = vpop.eup %2912 }
 0x6fc   :  { %v1983_v43 = vadd.f32 0.5, %v1982_v1  ;;  %v1987_v27 = vmul.f32 0.5, %v2913_v23 }
 0x6fd   :  { %v1990_v47 = vmul.f32 %v2911_v17, %v1979_v2 }
 0x6fe   :  { %v1989_v25 = vmul.f32 %v1983_v43, %v3677_v55  ;;  %v1988_v32 = vadd.f32 0.5, %v1987_v27 }
 0x700   :  { %v1991_v63 = vadd.f32 %v1990_v47, %v1989_v25 }
 0x702   :  { %2914 = vtanh.f32 %v1991_v63  ;;  %v2000_v40 = vsel %vm1999_vm15, %v1991_v63, %v3677_v55 }
 0x70c   :  { %v2915_v41 = vpop.eup %2914 }
 0x70d   :  { %v1993_v50 = vmul.f32 %v2915_v41, %v1988_v32 }
 0x70f   :  { %v2001_v54 = vsel %vm1999_vm15, %v1993_v50, %v3680_v46 }
 0x710   :  { %2003 = vst [vmem:[#allocation6 + $0x30] sm:$0xff] %v2001_v54  ;;  %2140 = vmatmul.mubr.f32.vlgmr.msra.gmra.mrb[30].mxu0 %v2001_v54  ;;  %2211 = vmatmul.mubr.f32.vlgmr.msra.gmra.mrb[30].mxu1 %v2001_v54 }
 0x7e3   :  { %v2141_v6 = vpop.f32.mrb[30].mxu0  ;;  %v2212_v16 = vpop.f32.mrb[30].mxu1 }
 0x7e4   :  { %v2217_v42 = vadd.f32 %v2141_v6, %v3797_v61  ;;  %v2219_v37 = vadd.f32 %v2212_v16, %v3798_v24  ;;  %v2143_v3 = vpop.f32.mrb[31].mxu0  ;;  %v2214_v20 = vpop.f32.mrb[31].mxu1 }
 0x7e5   :  { %v2218_v55 = vadd.f32 %v2143_v3, %v3799_v11  ;;  %v2220_v39 = vadd.f32 %v2214_v20, %v3364_v56 }
 0x7e6   :  { %v2221_v44 = vmul.f32 0.5, %v2217_v42 }
 0x7e7   :  { %v2225_v9 = vmul.f32 0.5, %v2218_v55  ;;  %v2230_v46 = vmul.f32 0.5, %v2220_v39 }
 0x7e8   :  { %2916 = vtanh.f32 %v2221_v44 }
 0x7e9   :  { %2918 = vtanh.f32 %v2225_v9 }
 0x7ea   :  { %2920 = vtanh.f32 %v2219_v37 }
 0x7eb   :  { %2922 = vtanh.f32 %v2230_v46 }
 0x7f2   :  { %v2917_v12 = vpop.eup %2916 }
 0x7f3   :  { %v2919_v62 = vpop.eup %2918  ;;  %v2223_v8 = vmul.f32 0.5, %v2917_v12 }
 0x7f4   :  { %v2227_v30 = vmul.f32 0.5, %v2919_v62  ;;  %v2921_v58 = vpop.eup %2920 }
 0x7f5   :  { %v2224_v31 = vadd.f32 0.5, %v2223_v8  ;;  %v2923_v29 = vpop.eup %2922 }
 0x7f6   :  { %v2228_v52 = vadd.f32 0.5, %v2227_v30  ;;  %v2232_v35 = vmul.f32 0.5, %v2923_v29 }
 0x7f7   :  { %v2235_v59 = vmul.f32 %v2921_v58, %v2224_v31 }
 0x7f8   :  { %v2234_v34 = vmul.f32 %v2228_v52, %v2000_v40  ;;  %v2233_v0 = vadd.f32 0.5, %v2232_v35 }
 0x7fa   :  { %v2236_v5 = vadd.f32 %v2235_v59, %v2234_v34 }
 0x7fc   :  { %2924 = vtanh.f32 %v2236_v5  ;;  %v2245_v56 = vsel %vm2244_vm0, %v2236_v5, %v2000_v40 }
 0x7fd   :  { %2250 = vst [vmem:[#allocation9] sm:$0xff] %v2245_v56 }
 0x806   :  { %v2925_v51 = vpop.eup %2924 }
 0x807   :  { %v2238_v7 = vmul.f32 %v2925_v51, %v2233_v0 }
 0x809   :  { %v2246_v18 = vsel %vm2244_vm0, %v2238_v7, %v2001_v54 }
 0x80a   :  { %2248 = vst [vmem:[#allocation6 + $0x38] sm:$0xff] %v2246_v18  ;;  %2249 = vst [vmem:[#allocation7] sm:$0xff] %v2246_v18 }
 0x80b   :  { %2959 = shalt.err (!%p2956_p12)
}
 0x80c   :  { %s2960_s23 = scalar_lea.hbm %s3756_s6, 128 }
 0x80d   :  { %p2961_p13 = scmp.ne.s32.totalorder %s3756_s6, %s2960_s23  ;;  %p2964_p0 = scmp.lt.u32.totalorder %s2960_s23, %s3756_s6 }
 0x80f   :  { %p2966_p1 = pnand %p2964_p0, %p2961_p13 }
 0x811   :  { %2969 = shalt.err (!%p2966_p1)
}
 0x812   :  { %2272 = dma.vmem_to_hbm [thread:$0]  %s2270_s16, 128, %s3756_s6, [#allocation8]  }
 0x813   :  { %s2970_s29 = scalar_lea.vmem %s3699_s18, 1024  ;;  %p2975_p3 = scmp.lt.s32.totalorder %s3699_s18, %s3699_s18 }
 0x814   :  { %p2971_p2 = scmp.ne.s32.totalorder %s3699_s18, %s2970_s29  ;;  %p2976_p4 = scmp.lt.s32.totalorder %s2970_s29, %s2970_s29 }
 0x816   :  { %p2977_p5 = por %p2976_p4, %p2975_p3 }
 0x818   :  { %p2978_p6 = pnand %p2977_p5, %p2971_p2 }
 0x81a   :  { %2981 = shalt.err (!%p2978_p6)
}
 0x81b   :  { %s2982_s9 = scalar_lea.hbm %s3755_s5, 1024 }
 0x81c   :  { %p2983_p7 = scmp.ne.s32.totalorder %s3755_s5, %s2982_s9  ;;  %p2986_p8 = scmp.lt.u32.totalorder %s2982_s9, %s3755_s5 }
 0x81e   :  { %p2988_p9 = pnand %p2986_p8, %p2983_p7 }
 0x820   :  { %2991 = shalt.err (!%p2988_p9)
}
 0x821   :  { %s3028_s6 = smov 128   ;;  %s3029_s0 = smov 8  }
 0x822   :  { %2262 = dma.vmem_to_hbm [thread:$0]  %s3699_s18, 1024, %s3755_s5, [#allocation5], %s3028_s6, %s3028_s6, %s3029_s0  }
 0x823   :  { %s2992_s15 = scalar_lea.vmem %s3702_s19, 128  ;;  %p2997_p11 = scmp.lt.s32.totalorder %s3702_s19, %s3702_s19 }
 0x824   :  { %p2993_p10 = scmp.ne.s32.totalorder %s3702_s19, %s2992_s15  ;;  %p2998_p12 = scmp.lt.s32.totalorder %s2992_s15, %s2992_s15 }
 0x826   :  { %p2999_p13 = por %p2998_p12, %p2997_p11 }
 0x828   :  { %p3000_p0 = pnand %p2999_p13, %p2993_p10 }
 0x82a   :  { %3003 = shalt.err (!%p3000_p0)
}
 0x82b   :  { %s3004_s17 = scalar_lea.hbm %s3757_s7, 128 }
 0x82c   :  { %p3005_p1 = scmp.ne.s32.totalorder %s3757_s7, %s3004_s17  ;;  %p3008_p2 = scmp.lt.u32.totalorder %s3004_s17, %s3757_s7 }
 0x82e   :  { %p3010_p3 = pnand %p3008_p2, %p3005_p1 }
 0x830   :  { %3013 = shalt.err (!%p3010_p3)
}
 0x831   :  { %2282 = dma.vmem_to_hbm [thread:$0]  %s3702_s19, 128, %s3757_s7, [#allocation8]  }
 0x832   :  { %3016 = dma.done.wait [#allocation5], 1024  }
 0x833   :  { %3017 = vsyncadd [#allocation5], 4294966272 }
 0x834   :  { %3018 = dma.done.wait [#allocation8], 256  }
 0x835   :  { %3019 = vsyncadd [#allocation8], 4294967040 }
 0x836   :  { %2292 = vsyncpa [#allocation4], 1 }
 0x837   :  { %2293 = vsyncpa [#allocation5], 1 }
 0x838   :  { %2294 = vsyncpa [#allocation8], 1 }

</bundles_post_ra>
